<compile_context>
chip_gen: v6e
topology: v6e:2x2x1
jax: 0.10.0
libtpu: 0.0.40
codegen_flags: <defaults>
</compile_context>

<pallas_src>
import functools

import jax
import jax.numpy as jnp
from jax import lax
from jax.experimental import pallas as pl
from jax.experimental.pallas import tpu as pltpu

_PRECISION = lax.Precision.HIGHEST


def _pick_batch_block(n, max_b=8):
    """Largest B <= max_b dividing n that still leaves >= 2 grid steps."""
    best = 1
    for b in range(1, min(max_b, n) + 1):
        if n % b == 0 and n // b >= 2:
            best = b
    return best


def _pool_matrix(n, k):
    """(n, n//k) matrix M with M[j, q] = 1/k iff q == j//k and j < (n//k)*k."""
    n_out = n // k
    idx = jnp.arange(n)
    tgt = jnp.where(idx < n_out * k, idx // k, n_out)   # implicit crop, like AvgPool2d
    m = jax.nn.one_hot(tgt, n_out + 1, dtype=jnp.float32)[:, :n_out]
    return m * (1.0 / k)


def _make_pool_kernel(B, Cout, H, W, Hp, Wp):
    HWp = Hp * Wp

    def kernel(x_ref, w_ref, b_ref, pw_ref, ph_ref, o_ref):
        # x_ref: (B, Cin, H*W)  channels on sublanes, spatial on lanes
        # w_ref: (Cout, Cin)    1x1 conv weight
        # b_ref: (Cout, 1)      conv bias
        # pw_ref: (Cout, W, Wp) W-pool matrix (entries 1/k), batched over Cout
        # ph_ref: (Cout, Hp, H) H-pool matrix (entries 1/k), batched over Cout
        # o_ref: (B, Cout, Hp*Wp)
        w = w_ref[...]
        b = b_ref[...]
        pw = pw_ref[...]
        ph = ph_ref[...]
        for i in range(B):  # static unroll over the images of this block
            x = x_ref[i]                                         # (Cin, HW)
            y = jnp.dot(w, x, precision=_PRECISION,
                        preferred_element_type=jnp.float32)      # (Cout, HW)
            y = jnp.maximum(y + b, 0.0)                          # bias + ReLU
            y3 = y.reshape(Cout, H, W)
            # Separable average pool: along W, then along H (batched over Cout).
            yw = jnp.einsum('chw,cwv->chv', y3, pw,
                            precision=_PRECISION,
                            preferred_element_type=jnp.float32)  # (Cout, H, Wp)
            yp = jnp.einsum('cph,chv->cpv', ph, yw,
                            precision=_PRECISION,
                            preferred_element_type=jnp.float32)  # (Cout, Hp, Wp)
            o_ref[i] = yp.reshape(Cout, HWp).astype(o_ref.dtype)

    return kernel


def _make_nopool_kernel(B):
    def kernel(x_ref, w_ref, b_ref, o_ref):
        # last_block: conv + bias + ReLU only (pooling statically removed)
        w = w_ref[...]
        b = b_ref[...]
        for i in range(B):
            x = x_ref[i]                                         # (Cin, HW)
            y = jnp.dot(w, x, precision=_PRECISION,
                        preferred_element_type=jnp.float32)      # (Cout, HW)
            o_ref[i] = jnp.maximum(y + b, 0.0).astype(o_ref.dtype)

    return kernel


@functools.partial(jax.jit, static_argnames=("avg_pool_size", "last_block"))
def fbstream1_forward(x_nchw, weight, bias, avg_pool_size, last_block=False):
    """x_nchw: (N, 32, H, W); weight: (Cout=10, Cin=32); bias: (Cout,)."""
    N, Cin, H, W = x_nchw.shape
    Cout = weight.shape[0]
    k = 1 if last_block else avg_pool_size
    Hp, Wp = H // k, W // k
    HW, HWp = H * W, Hp * Wp

    B = _pick_batch_block(N)
    grid = (N // B,)

    # Layout glue: pure reshapes only (no transposes / extra HBM traffic).
    x_flat = x_nchw.reshape(N, Cin, HW).astype(jnp.float32)
    w = weight.astype(jnp.float32)                    # (Cout, Cin)
    b2 = bias.reshape(Cout, 1).astype(jnp.float32)    # (Cout, 1)

    const = dict(pipeline_mode=pl.Buffered(1))  # single-buffer grid-invariant operands
    in_specs = [
        pl.BlockSpec((B, Cin, HW), lambda i: (i, 0, 0)),
        pl.BlockSpec((Cout, Cin), lambda i: (0, 0), **const),
        pl.BlockSpec((Cout, 1), lambda i: (0, 0), **const),
    ]
    args = [x_flat, w, b2]

    if k > 1:
        # Separable pooling operands: linear in H and W (constant-folded at compile).
        pw = jnp.broadcast_to(_pool_matrix(W, k)[None], (Cout, W, Wp))
        ph = jnp.broadcast_to(_pool_matrix(H, k).T[None], (Cout, Hp, H))
        in_specs += [
            pl.BlockSpec((Cout, W, Wp), lambda i: (0, 0, 0), **const),
            pl.BlockSpec((Cout, Hp, H), lambda i: (0, 0, 0), **const),
        ]
        args += [pw, ph]
        kernel = _make_pool_kernel(B, Cout, H, W, Hp, Wp)
    else:
        kernel = _make_nopool_kernel(B)

    # NOTE: one grid step keeps B*Cin*HW f32 live in VMEM; for very large
    # spatial sizes an additional H-tile grid axis (tile multiple of k) would
    # be added to stay under the scoped-VMEM budget.
    out = pl.pallas_call(
        kernel,
        out_shape=jax.ShapeDtypeStruct((N, Cout, HWp), jnp.float32),
        grid_spec=pltpu.PrefetchScalarGridSpec(
            num_scalar_prefetch=0,
            grid=grid,
            in_specs=in_specs,
            out_specs=pl.BlockSpec((B, Cout, HWp), lambda i: (i, 0, 0)),
        ),
        compiler_params=pltpu.CompilerParams(
            dimension_semantics=("parallel",)),  # v7x: shard batch over 2 TCs
    )(*args)

    # (N, Cout, Hp*Wp) -> NCHW via reshape only (no transpose needed).
    return out.reshape(N, Cout, Hp, Wp)


def fbstream1_reference(x_nchw, weight, bias, avg_pool_size, last_block=False):
    y = jnp.einsum('oc,nchw->nohw', weight, x_nchw,
                   precision=_PRECISION) + bias[None, :, None, None]
    y = jnp.maximum(y, 0.0)
    if last_block:
        return y
    k = avg_pool_size
    N, Co, H, W = y.shape
    Hp, Wp = H // k, W // k
    y = y[:, :, :Hp * k, :Wp * k].reshape(N, Co, Hp, k, Wp, k)
    return y.mean(axis=(3, 5))


if __name__ == "__main__":
    key = jax.random.PRNGKey(0)
    k_x, k_w, k_b = jax.random.split(key, 3)

    N, Cin, H, W = 2, 32, 16, 16
    Cout = 10
    avg_pool_size = 2

    x = jax.random.normal(k_x, (N, Cin, H, W), dtype=jnp.float32)
    # Deterministic synthetic params (PyTorch Conv2d(32,10,1): w (10,32,1,1), b (10,))
    weight = jax.random.normal(k_w, (Cout, Cin), dtype=jnp.float32) * 0.1
    bias = jax.random.normal(k_b, (Cout,), dtype=jnp.float32) * 0.1

    # Pooling block
    out = fbstream1_forward(x, weight, bias, avg_pool_size)
    out = jax.block_until_ready(out)
    ref = fbstream1_reference(x, weight, bias, avg_pool_size)
    assert out.shape == (N, Cout, H // avg_pool_size, W // avg_pool_size), out.shape
    assert jnp.allclose(out, ref, atol=1e-5, rtol=1e-5), \
        float(jnp.max(jnp.abs(out - ref)))

    # Last block (no pooling) path
    out_lb = fbstream1_forward(x, weight, bias, avg_pool_size, last_block=True)
    out_lb = jax.block_until_ready(out_lb)
    ref_lb = fbstream1_reference(x, weight, bias, avg_pool_size, last_block=True)
    assert out_lb.shape == (N, Cout, H, W), out_lb.shape
    assert jnp.allclose(out_lb, ref_lb, atol=1e-5, rtol=1e-5), \
        float(jnp.max(jnp.abs(out_lb - ref_lb)))

    print("KERNEL_OK")
</pallas_src>

<mosaic_0001>
module attributes {stable_mosaic.version = 11 : i64} {
  func.func @kernel(%arg0: i32, %arg1: memref<1x32x256xf32, #tpu.memory_space<vmem>>, %arg2: memref<10x32xf32, #tpu.memory_space<vmem>>, %arg3: memref<10x1xf32, #tpu.memory_space<vmem>>, %arg4: memref<10x16x8xf32, #tpu.memory_space<vmem>>, %arg5: memref<10x8x16xf32, #tpu.memory_space<vmem>>, %arg6: memref<1x10x64xf32, #tpu.memory_space<vmem>>) attributes {dimension_semantics = [#tpu.dimension_semantics<parallel>], iteration_bounds = array<i64: 2>, scalar_prefetch = 0 : i64, scratch_operands = 0 : i64, tpu.core_type = #tpu.core_type<tc>, window_params = [{transform_indices = @transform_0, window_bounds = array<i64: 1, 32, 256>}, {pipeline_mode = #tpu.pipeline_mode<synchronous>, transform_indices = @transform_1, window_bounds = array<i64: 10, 32>}, {pipeline_mode = #tpu.pipeline_mode<synchronous>, transform_indices = @transform_2, window_bounds = array<i64: 10, 1>}, {pipeline_mode = #tpu.pipeline_mode<synchronous>, transform_indices = @transform_3, window_bounds = array<i64: 10, 16, 8>}, {pipeline_mode = #tpu.pipeline_mode<synchronous>, transform_indices = @transform_4, window_bounds = array<i64: 10, 8, 16>}, {transform_indices = @transform_5, window_bounds = array<i64: 1, 10, 64>}]} {
    %c0 = arith.constant 0 : index
    %c0_0 = arith.constant 0 : index
    %0 = vector.load %arg2[%c0, %c0_0] : memref<10x32xf32, #tpu.memory_space<vmem>>, vector<10x32xf32>
    %c0_1 = arith.constant 0 : index
    %c0_2 = arith.constant 0 : index
    %1 = vector.load %arg3[%c0_1, %c0_2] : memref<10x1xf32, #tpu.memory_space<vmem>>, vector<10x1xf32>
    %c0_3 = arith.constant 0 : index
    %c0_4 = arith.constant 0 : index
    %c0_5 = arith.constant 0 : index
    %2 = vector.load %arg4[%c0_3, %c0_4, %c0_5] : memref<10x16x8xf32, #tpu.memory_space<vmem>>, vector<10x16x8xf32>
    %c0_6 = arith.constant 0 : index
    %c0_7 = arith.constant 0 : index
    %c0_8 = arith.constant 0 : index
    %3 = vector.load %arg5[%c0_6, %c0_7, %c0_8] : memref<10x8x16xf32, #tpu.memory_space<vmem>>, vector<10x8x16xf32>
    %c0_9 = arith.constant 0 : index
    %c0_10 = arith.constant 0 : index
    %c0_11 = arith.constant 0 : index
    %4 = vector.load %arg1[%c0_9, %c0_10, %c0_11] : memref<1x32x256xf32, #tpu.memory_space<vmem>>, vector<1x32x256xf32>
    %5 = vector.shape_cast %4 : vector<1x32x256xf32> to vector<32x256xf32>
    %cst = arith.constant dense<0.000000e+00> : vector<10x256xf32>
    %6 = tpu.matmul %0, %5, %cst {dimension_numbers = #tpu.dot_dimension_numbers<[1], [0], [0], [1], [0, 0, 1, 1], [], []>, precision = #tpu.contract_precision<fp32>} : vector<10x32xf32>, vector<32x256xf32>, vector<10x256xf32> -> vector<10x256xf32>
    %7 = vector.broadcast %1 : vector<10x1xf32> to vector<10x256xf32>
    %8 = arith.addf %6, %7 : vector<10x256xf32>
    %cst_12 = arith.constant 0.000000e+00 : f32
    %9 = vector.broadcast %cst_12 : f32 to vector<10x256xf32>
    %10 = arith.maximumf %8, %9 : vector<10x256xf32>
    %11 = vector.shape_cast %10 : vector<10x256xf32> to vector<10x16x16xf32>
    "tpu.trace_start"() <{level = 10 : i32, message = "chw,cwv->chv"}> : () -> ()
    %cst_13 = arith.constant dense<0.000000e+00> : vector<10x16x8xf32>
    %12 = tpu.matmul %11, %2, %cst_13 {dimension_numbers = #tpu.dot_dimension_numbers<[2], [1], [1], [2], [0, 0, 0, 1, 1, 2], [0], [0]>, precision = #tpu.contract_precision<fp32>} : vector<10x16x16xf32>, vector<10x16x8xf32>, vector<10x16x8xf32> -> vector<10x16x8xf32>
    "tpu.trace_stop"() : () -> ()
    "tpu.trace_start"() <{level = 10 : i32, message = "cph,chv->cpv"}> : () -> ()
    %cst_14 = arith.constant dense<0.000000e+00> : vector<10x8x8xf32>
    %13 = tpu.matmul %3, %12, %cst_14 {dimension_numbers = #tpu.dot_dimension_numbers<[2], [1], [1], [2], [0, 0, 0, 1, 1, 2], [0], [0]>, precision = #tpu.contract_precision<fp32>} : vector<10x8x16xf32>, vector<10x16x8xf32>, vector<10x8x8xf32> -> vector<10x8x8xf32>
    "tpu.trace_stop"() : () -> ()
    %14 = vector.shape_cast %13 : vector<10x8x8xf32> to vector<10x64xf32>
    %c0_15 = arith.constant 0 : index
    %c0_16 = arith.constant 0 : index
    %c0_17 = arith.constant 0 : index
    %15 = vector.load %arg6[%c0_15, %c0_16, %c0_17] : memref<1x10x64xf32, #tpu.memory_space<vmem>>, vector<1x10x64xf32>
    %16 = vector.shape_cast %15 : vector<1x10x64xf32> to vector<10x64xf32>
    %17 = vector.shape_cast %14 : vector<10x64xf32> to vector<1x10x64xf32>
    tpu.vector_store %arg6[%c0_15, %c0_16, %c0_17], %17 {strides = array<i32>} : memref<1x10x64xf32, #tpu.memory_space<vmem>>, vector<1x10x64xf32>,
    return
  }
  func.func @transform_0(%arg0: i32) -> (i32, i32, i32) {
    %c0_i32 = arith.constant 0 : i32
    %c0_i32_0 = arith.constant 0 : i32
    %c0_i32_1 = arith.constant 0 : i32
    return %arg0, %c0_i32, %c0_i32_0 : i32, i32, i32
  }
  func.func @transform_1(%arg0: i32) -> (i32, i32) {
    %c0_i32 = arith.constant 0 : i32
    %c0_i32_0 = arith.constant 0 : i32
    %c0_i32_1 = arith.constant 0 : i32
    return %c0_i32, %c0_i32_0 : i32, i32
  }
  func.func @transform_2(%arg0: i32) -> (i32, i32) {
    %c0_i32 = arith.constant 0 : i32
    %c0_i32_0 = arith.constant 0 : i32
    %c0_i32_1 = arith.constant 0 : i32
    return %c0_i32, %c0_i32_0 : i32, i32
  }
  func.func @transform_3(%arg0: i32) -> (i32, i32, i32) {
    %c0_i32 = arith.constant 0 : i32
    %c0_i32_0 = arith.constant 0 : i32
    %c0_i32_1 = arith.constant 0 : i32
    %c0_i32_2 = arith.constant 0 : i32
    return %c0_i32, %c0_i32_0, %c0_i32_1 : i32, i32, i32
  }
  func.func @transform_4(%arg0: i32) -> (i32, i32, i32) {
    %c0_i32 = arith.constant 0 : i32
    %c0_i32_0 = arith.constant 0 : i32
    %c0_i32_1 = arith.constant 0 : i32
    %c0_i32_2 = arith.constant 0 : i32
    return %c0_i32, %c0_i32_0, %c0_i32_1 : i32, i32, i32
  }
  func.func @transform_5(%arg0: i32) -> (i32, i32, i32) {
    %c0_i32 = arith.constant 0 : i32
    %c0_i32_0 = arith.constant 0 : i32
    %c0_i32_1 = arith.constant 0 : i32
    return %arg0, %c0_i32, %c0_i32_0 : i32, i32, i32
  }
}

</mosaic_0001>

<bundles_post_ra>
// kernel: fbstream1_forward.1
= control target key start
LH: loop header
LB: loop body
LE: loop exit
PB: predicated region body
PF: predicated region fallthrough
CT: control target
= control target key end

     0   :  { %s12730_s18 = smov 0   ;;  %s14486_s0 = inlined_call_operand.vmem [shape: f32[2,32,256], index: 0, kind: input, shape index: {}]   ;;  %s14487_s1 = inlined_call_operand.vmem [shape: f32[10,32], index: 1, kind: input, shape index: {}]   ;;  %s14488_s2 = inlined_call_operand.vmem [shape: f32[10,1], index: 2, kind: input, shape index: {}]   ;;  %s14489_s3 = inlined_call_operand.vmem [shape: f32[10,16,8], index: 3, kind: input, shape index: {}]   ;;  %s14490_s4 = inlined_call_operand.vmem [shape: f32[10,8,16], index: 4, kind: input, shape index: {}]   ;;  %s14491_s5 = inlined_call_operand.vmem [shape: f32[2,10,64], index: 5, kind: output, shape index: {}]  }
   0x1 LB: > { %s11377_s19 = sadd.s32 4294967295, %s12682_s18   ;;  %p11381_p0 = scmp.ge.s32.totalorder %s12682_s18, 1  ;;  %s12682_s18 = sphi %s12730_s18, %s15_s18  }
   0x2   : > { %p187_p1 = scmp.lt.s32.totalorder %s12682_s18, 3 }
   0x4   : > { %p188_p2 = pnand %p11381_p0, %p187_p1 }
   0x5   : > { %p215_p3 = scmp.lt.s32.totalorder (!%p188_p2), %s11377_s19, 1  ;;  %s12686_s30 = smov (!%p188_p2), 96  }
   0x6   : > { %191 = sbr.rel (%p188_p2) target bundleno = 1189 (0x4a5), region = 40  ;;  %s12687_s6 = smov (!%p188_p2), 112  }
   0x7   : > { %s12688_s7 = smov (!%p188_p2), 80   ;;  %s12689_s8 = smov (!%p188_p2), 64  }
   0x8   : > { %s12690_s9 = smov (!%p188_p2), 48   ;;  %s12691_s10 = smov (!%p188_p2), 32  }
   0x9   : > { %s12692_s11 = smov (!%p188_p2), 16   ;;  %s12697_s15 = smov (!%p188_p2), 24  }
   0xa   : > { %s12698_s16 = smov (!%p188_p2), 40   ;;  %s12699_s17 = smov (!%p188_p2), 56  }
   0xb   : > { %v225_v0 = vld [vmem:[%s14487_s1] sm:$0xff]  ;;  %vm277_vm0 = vcmask 261120   ;;  %v226_v1 = vld [vmem:[%s14487_s1 + $0x8] sm:$0x3]  ;;  %v12684_v2 = vmov 0.0   ;;  %s14493_s19 = smov (!%p215_p3, %s11377_s19), 1 }
   0xc   : > { %356 = vmatprep.mubr.f32.mxu0 %v12684_v2  ;;  %v279_v3 = vsel %vm277_vm0, %v225_v0, 0  ;;  %v282_v4 = vsel %vm277_vm0, %v226_v1, 0  ;;  %483 = vmatprep.mubr.f32.mxu1 %v12684_v2  ;;  %v227_v5 = vld [vmem:[%s14488_s2] sm:$0xff]  ;;  %v12685_v8 = vmov 0   ;;  %s11388_s26 = sshll.u32 %s14493_s19, 6  ;;  %vm1340_vm1 = vcmask 130048  }
   0xd   : > { %v12753_v6 = vand.u32 4294901760, %v279_v3  ;;  %v12755_v7 = vand.u32 4294901760, %v282_v4  ;;  %12674 = vset.pattern.permute.xlu0 %v12685_v8  ;;  %12675 = vset.pattern.permute.xlu1 %v12685_v8  ;;  %s219_s29 = scalar_lea.vmem %s14486_s0, %s11388_s26  ;;  %vm12695_vm2 = vmmov 0   ;;  %vm11299_vm3 = vcmask 64512  }
   0xe   : > { %269 = vperm.xlu0 %12674, %v227_v5   ;;  %v266_v11 = vld [vmem:[%s219_s29 + $0x38] sm:$0xff]  ;;  %v265_v12 = vld [vmem:[%s219_s29 + $0x30] sm:$0xff]  ;;  %v264_v13 = vld [vmem:[%s219_s29 + $0x28] sm:$0xff]  ;;  %vm11304_vm4 = vcmask 195584   ;;  %vm11309_vm5 = vcmask 326656   ;;  %vm11312_vm6 = vcmask 392192  }
   0xf   : > { %v12759_v9 = vsub.f32 %v279_v3, %v12753_v6  ;;  %v12765_v10 = vsub.f32 %v282_v4, %v12755_v7  ;;  %v12768_v15 = vand.u32 4294901760, %v266_v11  ;;  %v12770_v16 = vand.u32 4294901760, %v265_v12  ;;  %v263_v18 = vld [vmem:[%s219_s29 + $0x20] sm:$0xff]  ;;  %v262_v19 = vld [vmem:[%s219_s29 + $0x18] sm:$0xff]  ;;  %v261_v20 = vld [vmem:[%s219_s29 + $0x10] sm:$0xff] }
  0x10   : > { %v12772_v17 = vand.u32 4294901760, %v264_v13  ;;  %v12774_v21 = vand.u32 4294901760, %v263_v18  ;;  %v12776_v22 = vand.u32 4294901760, %v262_v19  ;;  %v12778_v23 = vand.u32 4294901760, %v261_v20  ;;  %v260_v24 = vld [vmem:[%s219_s29 + $0x8] sm:$0xff]  ;;  %v259_v25 = vld [vmem:[%s219_s29] sm:$0xff] }
  0x11   : > { %v359_v14 = vand.u32 4294901760, %v12759_v9  ;;  %309 = vmatprep.subr.mxu0 %v12768_v15  ;;  %v12784_v27 = vand.u32 4294901760, %v260_v24  ;;  %v12787_v28 = vsub.f32 %v266_v11, %v12768_v15  ;;  %v12790_v29 = vsub.f32 %v265_v12, %v12770_v16 }
  0x12   : > { %v370_v30 = vand.u32 4294901760, %v12765_v10  ;;  %311 = vmatpush1.msra.mxu0 %v12770_v16  ;;  %v12794_v31 = vand.u32 4294901760, %v259_v25  ;;  %v12797_v32 = vsub.f32 %v264_v13, %v12772_v17  ;;  %v12800_v33 = vsub.f32 %v263_v18, %v12774_v21 }
  0x13   : > { %v360_v26 = vsub.f32 %v12759_v9, %v359_v14  ;;  %v12803_v34 = vsub.f32 %v262_v19, %v12776_v22  ;;  %313 = vmatprep.subr.mxu0 %v12772_v17  ;;  %v405_v35 = vand.u32 4294901760, %v12787_v28  ;;  %v411_v36 = vand.u32 4294901760, %v12790_v29 }
  0x14   : > { %v12809_v38 = vsub.f32 %v261_v20, %v12778_v23  ;;  %315 = vmatpush1.msra.mxu0 %v12774_v21  ;;  %v417_v39 = vand.u32 4294901760, %v12797_v32  ;;  %v423_v40 = vand.u32 4294901760, %v12800_v33  ;;  %v12816_v42 = vsub.f32 %v260_v24, %v12784_v27 }
  0x15   : > { %v361_v37 = vand.u32 4294901760, %v360_v26  ;;  %v429_v41 = vand.u32 4294901760, %v12803_v34  ;;  %317 = vmatprep.subr.mxu0 %v12776_v22  ;;  %v406_v43 = vsub.f32 %v12787_v28, %v405_v35  ;;  %v412_v44 = vsub.f32 %v12790_v29, %v411_v36 }
  0x16   : > { %v435_v45 = vand.u32 4294901760, %v12809_v38  ;;  %v371_v46 = vsub.f32 %v12765_v10, %v370_v30  ;;  %319 = vmatpush1.msra.mxu0 %v12778_v23  ;;  %v418_v47 = vsub.f32 %v12797_v32, %v417_v39  ;;  %v424_v48 = vsub.f32 %v12800_v33, %v423_v40 }
  0x17   : > { %v430_v49 = vsub.f32 %v12803_v34, %v429_v41  ;;  %v441_v50 = vand.u32 4294901760, %v12816_v42  ;;  %321 = vmatprep.subr.mxu0 %v12784_v27  ;;  %v407_v51 = vand.u32 4294901760, %v406_v43  ;;  %v413_v52 = vand.u32 4294901760, %v412_v44 }
  0x18   : > { %v436_v53 = vsub.f32 %v12809_v38, %v435_v45  ;;  %v446_v54 = vsub.f32 %v259_v25, %v12794_v31  ;;  %323 = vmatpush1.msra.mxu0 %v12794_v31  ;;  %v419_v55 = vand.u32 4294901760, %v418_v47  ;;  %v425_v56 = vand.u32 4294901760, %v424_v48 }
  0x19   : > { %v442_v57 = vsub.f32 %v12816_v42, %v441_v50  ;;  %408 = vmatprep.subr.mxu1 %v407_v51  ;;  %362 = vmatmul.mubr.f32.vlgmr.msra.gmra.mxu0 %v361_v37  ;;  %v431_v58 = vand.u32 4294901760, %v430_v49  ;;  %v372_v61 = vand.u32 4294901760, %v371_v46  ;;  %v230_v37 = vld [vmem:[%s14489_s3 + $0x8] sm:$0xff]  ;;  %vm11315_vm7 = vcmask 457728  }
  0x1a   : > { %v447_v59 = vand.u32 4294901760, %v446_v54  ;;  %414 = vmatpush1.msra.mxu1 %v413_v52  ;;  %524 = vmatprep.subr.mxu0 %v12787_v28  ;;  %v437_v60 = vand.u32 4294901760, %v436_v53  ;;  %v228_v49 = vld [vmem:[%s14488_s2 + $0x8] sm:$0x3]  ;;  %v973_v52 = vlaneseq  ;;  %vm11318_vm8 = vcmask 523264  }
  0x1b   : > { %420 = vmatprep.subr.mxu1 %v419_v55  ;;  %527 = vmatpush1.msra.mxu0 %v12790_v29  ;;  %v443_v62 = vand.u32 4294901760, %v442_v57  ;;  %vm11320_vm9 = vcmask 517120  }
  0x1c   : > { %v448_v63 = vsub.f32 %v446_v54, %v447_v59  ;;  %426 = vmatpush1.msra.mxu1 %v425_v56  ;;  %530 = vmatprep.subr.mxu0 %v12797_v32 }
  0x1d   : > { %432 = vmatprep.subr.mxu1 %v431_v58  ;;  %367 = vmatprep.mubr.f32.mxu0 %v12684_v2 }
  0x1e   : > { %v449_v0 = vand.u32 4294901760, %v448_v63  ;;  %438 = vmatpush1.msra.mxu1 %v437_v60  ;;  %533 = vmatpush1.msra.mxu0 %v12800_v33 }
  0x1f   : > { %373 = vmatmul.mubr.f32.gmra.mxu0 %v372_v61  ;;  %444 = vmatprep.subr.mxu1 %v443_v62  ;;  %v12694_v62 = vmov 1934713408  }
  0x20   : > { %536 = vmatprep.subr.mxu0 %v12803_v34  ;;  %450 = vmatpush1.msra.mxu1 %v449_v0  ;;  %v1035_v63 = vunpack.c.l.s4 %v12694_v62 }
  0x21   : > { %539 = vmatpush1.msra.mxu0 %v12809_v38  ;;  %485 = vmatmul.mubr.f32.vlgmr.msra.gmra.mxu1 %v12753_v6  ;;  %v12923_v38 = vand.u32 4294901760, %v230_v37 }
  0x22   : > { %542 = vmatprep.subr.mxu0 %v12816_v42  ;;  %620 = vmatprep.subr.mxu1 %v12768_v15 }
  0x23   : > { %545 = vmatpush1.msra.mxu0 %v446_v54  ;;  %578 = vmatprep.mubr.f32.mxu0 %v12684_v2  ;;  %v974_v54 = vshrl.u32 %v973_v52, 7 }
  0x24   : > { %622 = vmatpush1.msra.mxu1 %v12770_v16  ;;  %581 = vmatmul.mubr.f32.vlgmr.msra.gmra.mxu0 %v12759_v9 }
  0x25   : > { %624 = vmatprep.subr.mxu1 %v12772_v17  ;;  %713 = vmatprep.subr.mxu0 %v405_v35 }
  0x26   : > { %490 = vmatprep.mubr.f32.mxu1 %v12684_v2  ;;  %626 = vmatpush1.msra.mxu1 %v12774_v21 }
  0x27   : > { %717 = vmatpush1.msra.mxu0 %v411_v36  ;;  %492 = vmatmul.mubr.f32.gmra.mxu1 %v12755_v7 }
  0x28   : > { %628 = vmatprep.subr.mxu1 %v12776_v22  ;;  %721 = vmatprep.subr.mxu0 %v417_v39  ;;  %v229_v39 = vld [vmem:[%s14489_s3] sm:$0xff] }
  0x29   : > { %586 = vmatprep.mubr.f32.mxu0 %v12684_v2  ;;  %630 = vmatpush1.msra.mxu1 %v12778_v23 }
  0x2a   : > { %725 = vmatpush1.msra.mxu0 %v423_v40  ;;  %632 = vmatprep.subr.mxu1 %v12784_v27  ;;  %v12933_v40 = vsub.f32 %v230_v37, %v12923_v38 }
  0x2b   : > { %589 = vmatmul.mubr.f32.gmra.mxu0 %v12765_v10  ;;  %729 = vmatprep.subr.mxu0 %v429_v41  ;;  %v12935_v41 = vand.u32 4294901760, %v229_v39 }
  0x2c   : > { %634 = vmatpush1.msra.mxu1 %v12794_v31  ;;  %667 = vmatprep.mubr.f32.mxu1 %v12684_v2  ;;  %v12939_v42 = vand.u32 4294901760, %v12933_v40 }
  0x2d   : > { %733 = vmatpush1.msra.mxu0 %v435_v45  ;;  %671 = vmatmul.mubr.f32.vlgmr.msra.gmra.mxu1 %v359_v14  ;;  %v12942_v43 = vsub.f32 %v229_v39, %v12935_v41 }
  0x2e   : > { %737 = vmatprep.subr.mxu0 %v441_v50  ;;  %814 = vmatprep.subr.mxu1 %v12768_v15  ;;  %v1466_v44 = vsub.f32 %v12933_v40, %v12939_v42  ;;  %v12693_v50 = vmov 1983009808  }
  0x2f   : > { %741 = vmatpush1.msra.mxu0 %v447_v59  ;;  %774 = vmatprep.mubr.f32.mxu0 %v12684_v2  ;;  %v12953_v45 = vand.u32 4294901760, %v12942_v43  ;;  %v971_v51 = vunpack.c.l.s4 %v12693_v50 }
  0x30   : > { %816 = vmatpush1.msra.mxu1 %v12770_v16  ;;  %776 = vmatmul.mubr.f32.vlgmr.msra.gmra.mxu0 %v12753_v6  ;;  %v1467_v46 = vand.u32 4294901760, %v1466_v44 }
  0x31   : > { %818 = vmatprep.subr.mxu1 %v12772_v17  ;;  %676 = vmatprep.mubr.f32.mxu1 %v12684_v2  ;;  %v1473_v47 = vsub.f32 %v12942_v43, %v12953_v45  ;;  %v972_v53 = vunpack.c.0.s8 %v971_v51 }
  0x32   : > { %820 = vmatpush1.msra.mxu1 %v12774_v21  ;;  %781 = vmatprep.mubr.f32.mxu0 %v12684_v2 }
  0x33   : > { %680 = vmatmul.mubr.f32.gmra.mxu1 %v370_v30  ;;  %822 = vmatprep.subr.mxu1 %v12776_v22  ;;  %v1474_v48 = vand.u32 4294901760, %v1473_v47  ;;  %v12967_v57 = vsub.s32 %v972_v53, %v974_v54 }
  0x34   : > { %824 = vmatpush1.msra.mxu1 %v12778_v23  ;;  %861 = vmatprep.mubr.f32.mxu1 %v12684_v2 }
  0x35   : > { %826 = vmatprep.subr.mxu1 %v12784_v27  ;;  %783 = vmatmul.mubr.f32.gmra.mxu0 %v12755_v7 }
  0x36   : > { %828 = vmatpush1.msra.mxu1 %v12794_v31  ;;  %11810 = vmatprep.subr.mxu0 %v12923_v38 }
  0x37   : > { %863 = vmatmul.mubr.f32.vlgmr.msra.gmra.mxu1 %v12753_v6  ;;  %11811 = vmatpush3.msra.mxu0 %v12923_v38 }
  0x38   : > { %868 = vmatprep.mubr.f32.mxu1 %v12684_v2  ;;  %11812 = vmatprep.subr.mxu0 %v12935_v41 }
  0x39   : > { %11813 = vmatpush3.msra.mxu0 %v12935_v41  ;;  %11817 = vmatprep.subr.mxu1 %v1467_v46 }
  0x3a   : > { %11824 = vmatprep.subr.mxu0 %v12933_v40  ;;  %11818 = vmatpush3.msra.mxu1 %v1467_v46 }
  0x3b   : > { %870 = vmatmul.mubr.f32.gmra.mxu1 %v12755_v7  ;;  %11819 = vmatprep.subr.mxu1 %v1474_v48 }
  0x3c   : > { %11820 = vmatpush3.msra.mxu1 %v1474_v48 }
  0x3d   : > { %11831 = vmatprep.subr.mxu1 %v12923_v38 }
  0x89   : > { %v270_v11 = vpop.permute.xlu0 %269 }
  0xd9   : > { %v363_v1 = vpop.f32.mrf.mxu0 }
  0xda   : > { %v364_v14 = vadd.f32 %v363_v1, %v270_v11 }
  0xdb   : > { %v365_v3 = vpop.f32.mrf.mxu0 }
  0xdc   : > { %v366_v23 = vadd.f32 %v365_v3, %v270_v11 }
  0xdf   : > { %v12884_v4 = vpop.f32.mrf.mxu0 }
  0xe1   : > { %v12886_v5 = vpop.f32.mrf.mxu0  ;;  %v486_v8 = vpop.f32.mrf.mxu1 }
  0xe2   : > { %v487_v16 = vadd.f32 %v486_v8, %v364_v14  ;;  %v1036_v14 = vunpack.c.0.s8 %v1035_v63 }
  0xe3   : > { %v488_v9 = vpop.f32.mrf.mxu1 }
  0xe4   : > { %v582_v10 = vpop.f32.mrf.mxu0  ;;  %v489_v25 = vadd.f32 %v488_v9, %v366_v23 }
  0xe5   : > { %v583_v19 = vadd.f32 %v582_v10, %v487_v16 }
  0xe6   : > { %v584_v13 = vpop.f32.mrf.mxu0 }
  0xe7   : > { %v12888_v12 = vpop.f32.mrf.mxu1  ;;  %v585_v29 = vadd.f32 %v584_v13, %v489_v25 }
  0xe9   : > { %v12890_v15 = vpop.f32.mrf.mxu1 }
  0xeb   : > { %v12892_v6 = vpop.f32.mrf.mxu0 }
  0xed   : > { %v672_v7 = vpop.f32.mrf.mxu1  ;;  %v12894_v17 = vpop.f32.mrf.mxu0 }
  0xee   : > { %v673_v20 = vadd.f32 %v672_v7, %v583_v19 }
  0xef   : > { %v674_v18 = vpop.f32.mrf.mxu1 }
  0xf0   : > { %v777_v21 = vpop.f32.mrf.mxu0  ;;  %v675_v31 = vadd.f32 %v674_v18, %v585_v29 }
  0xf1   : > { %v778_v26 = vadd.f32 %v777_v21, %v673_v20 }
  0xf2   : > { %v779_v32 = vpop.f32.mrf.mxu0 }
  0xf3   : > { %v12896_v22 = vpop.f32.mrf.mxu1  ;;  %v780_v34 = vadd.f32 %v779_v32, %v675_v31 }
  0xf5   : > { %v12898_v24 = vpop.f32.mrf.mxu1 }
  0xf7   : > { %v864_v27 = vpop.f32.mrf.mxu1 }
  0xf8   : > { %v865_v28 = vadd.f32 %v864_v27, %v778_v26  ;;  %v12979_v26 = vsub.s32 %v1036_v14, %v974_v54 }
  0xf9   : > { %v866_v33 = vpop.f32.mrf.mxu1 }
  0xfa   : > { %v12900_v30 = vmax.f32 %v865_v28, 0.0  ;;  %v867_v35 = vadd.f32 %v866_v33, %v780_v34 }
  0xfc   : > { %888 = vrot.lane.b32.xlu1 %v12900_v30, %s12686_s30  ;;  %882 = vrot.lane.b32.xlu0 %v12900_v30, %s12687_s6  ;;  %v12914_v36 = vmax.f32 %v867_v35, 0.0 }
 0x100   : > { %894 = vrot.lane.b32.xlu1 %v12900_v30, %s12688_s7  ;;  %900 = vrot.lane.b32.xlu0 %v12900_v30, %s12689_s8 }
 0x104   : > { %906 = vrot.lane.b32.xlu1 %v12900_v30, %s12690_s9  ;;  %912 = vrot.lane.b32.xlu0 %v12900_v30, %s12691_s10 }
 0x108   : > { %918 = vrot.lane.b32.xlu1 %v12900_v30, %s12692_s11  ;;  %926 = vrot.lane.b32.xlu0 %v12914_v36, %s12687_s6 }
 0x10c   : > { %932 = vrot.lane.b32.xlu1 %v12914_v36, %s12686_s30  ;;  %938 = vrot.lane.b32.xlu0 %v12914_v36, %s12688_s7 }
 0x110   : > { %944 = vrot.lane.b32.xlu1 %v12914_v36, %s12689_s8  ;;  %950 = vrot.lane.b32.xlu0 %v12914_v36, %s12690_s9 }
 0x114   : > { %956 = vrot.lane.b32.xlu1 %v12914_v36, %s12691_s10  ;;  %962 = vrot.lane.b32.xlu0 %v12914_v36, %s12692_s11 }
 0x118   : > { %274 = vperm.xlu1 %12675, %v228_v49  }
 0x16e   : > { %v889_v55 = vpop.permute.xlu1 %888  ;;  %v883_v56 = vpop.permute.xlu0 %882 }
 0x16f   : > { %v969_v58 = vcombine.high %v12900_v30, %v889_v55  ;;  %v968_v8 = vcombine.low %v12900_v30, %v889_v55 }
 0x171   : > { %v983_v1 = vrot.slane %v969_v58, %v12967_v57  ;;  %v12977_v19 = vrot.slane %v968_v8, %v12967_v57 }
 0x172   : > { %v895_v59 = vpop.permute.xlu1 %894  ;;  %v901_v60 = vpop.permute.xlu0 %900 }
 0x173   : > { %v985_v61 = vcombine.high %v883_v56, %v895_v59  ;;  %v984_v0 = vcombine.low %v883_v56, %v895_v59 }
 0x175   : > { %v999_v3 = vrot.slane %v985_v61, %v12967_v57  ;;  %v12974_v16 = vrot.slane %v984_v0, %v12967_v57 }
 0x176   : > { %v907_v9 = vpop.permute.xlu1 %906  ;;  %v913_v10 = vpop.permute.xlu0 %912 }
 0x177   : > { %v1048_v11 = vcombine.low %v983_v1, %v999_v3  ;;  %v1049_v13 = vcombine.high %v983_v1, %v999_v3  ;;  %v1001_v7 = vcombine.high %v901_v60, %v913_v10  ;;  %v1000_v18 = vcombine.low %v901_v60, %v913_v10 }
 0x178   : > { %v1032_v27 = vcombine.low %v12977_v19, %v12974_v16 }
 0x179   : > { %v12984_v28 = vrot.slane %v1000_v18, %v12967_v57  ;;  %v1015_v29 = vrot.slane %v1001_v7, %v12967_v57  ;;  %v13008_v52 = vrot.slane %v1048_v11, %v12979_v26  ;;  %v13011_v53 = vrot.slane %v1049_v13, %v12979_v26  ;;  %v232_v11 = vld [vmem:[%s14489_s3 + $0x18] sm:$0xff] }
 0x17a   : > { %v919_v20 = vpop.permute.xlu1 %918  ;;  %v927_v21 = vpop.permute.xlu0 %926  ;;  %v12994_v39 = vrot.slane %v1032_v27, %v12979_v26 }
 0x17b   : > { %v1016_v23 = vcombine.low %v907_v9, %v919_v20  ;;  %v1017_v25 = vcombine.high %v907_v9, %v919_v20 }
 0x17d   : > { %v12988_v30 = vrot.slane %v1016_v23, %v12967_v57  ;;  %v1031_v31 = vrot.slane %v1017_v25, %v12967_v57  ;;  %v13039_v23 = vand.u32 4294901760, %v232_v11  ;;  %v231_v25 = vld [vmem:[%s14489_s3 + $0x10] sm:$0xff] }
 0x17e   : > { %v933_v32 = vpop.permute.xlu1 %932  ;;  %v939_v33 = vpop.permute.xlu0 %938 }
 0x17f   : > { %v1064_v34 = vcombine.low %v12984_v28, %v12988_v30  ;;  %v1080_v35 = vcombine.low %v1015_v29, %v1031_v31  ;;  %v1081_v37 = vcombine.high %v1015_v29, %v1031_v31  ;;  %v1104_v44 = vcombine.low %v12914_v36, %v933_v32 }
 0x180   : > { %v1105_v46 = vcombine.high %v12914_v36, %v933_v32  ;;  %v1121_v47 = vcombine.high %v927_v21, %v939_v33  ;;  %v1120_v51 = vcombine.low %v927_v21, %v939_v33 }
 0x181   : > { %v12999_v48 = vrot.slane %v1064_v34, %v12979_v26  ;;  %v13002_v49 = vrot.slane %v1080_v35, %v12979_v26  ;;  %v13005_v50 = vrot.slane %v1081_v37, %v12979_v26  ;;  %v13026_v63 = vrot.slane %v1104_v44, %v12967_v57 }
 0x182   : > { %v1119_v54 = vrot.slane %v1105_v46, %v12967_v57  ;;  %v1135_v36 = vrot.slane %v1121_v47, %v12967_v57  ;;  %v945_v55 = vpop.permute.xlu1 %944  ;;  %v951_v56 = vpop.permute.xlu0 %950  ;;  %v13029_v0 = vrot.slane %v1120_v51, %v12967_v57  ;;  %v13058_v44 = vand.u32 4294901760, %v231_v25 }
 0x183   : > { %v1096_v58 = vcombine.low %v12994_v39, %v12999_v48  ;;  %v1100_v59 = vcombine.low %v13008_v52, %v13002_v49  ;;  %v1101_v60 = vcombine.high %v13008_v52, %v13002_v49  ;;  %v1102_v61 = vcombine.low %v13011_v53, %v13005_v50  ;;  %v242_v52 = vld [vmem:[%s14489_s3 + $0x68] sm:$0xff] }
 0x184   : > { %v1103_v62 = vcombine.high %v13011_v53, %v13005_v50  ;;  %v1184_v1 = vcombine.low %v1119_v54, %v1135_v36  ;;  %v1185_v3 = vcombine.high %v1119_v54, %v1135_v36  ;;  %v1168_v20 = vcombine.low %v13026_v63, %v13029_v0 }
 0x185   : > { %v1342_v10 = vsel %vm1340_vm1, %v1096_v58, 0  ;;  %v13062_v47 = vsub.f32 %v232_v11, %v13039_v23 }
 0x186   : > { %v957_v8 = vpop.permute.xlu1 %956  ;;  %v963_v9 = vpop.permute.xlu0 %962  ;;  %v13037_v21 = vand.u32 4294901760, %v1342_v10  ;;  %v1176_v51 = vrot.slane %v1168_v20, %v12979_v26  ;;  %v13076_v58 = vrot.slane %v1185_v3, %v12979_v26  ;;  %v1097_v20 = vcombine.high %v12994_v39, %v12999_v48 }
 0x187   : > { %v1136_v13 = vcombine.low %v945_v55, %v957_v8  ;;  %v1137_v14 = vcombine.high %v945_v55, %v957_v8  ;;  %v1152_v7 = vcombine.low %v951_v56, %v963_v9  ;;  %v1153_v18 = vcombine.high %v951_v56, %v963_v9 }
 0x188   : > { %11821 = vmatprep.mubr.f32.mxu1 %v13037_v21  ;;  %v13054_v33 = vsub.f32 %v1342_v10, %v13037_v21  ;;  %v13073_v56 = vrot.slane %v1184_v1, %v12979_v26  ;;  %v13080_v10 = vsub.f32 %v231_v25, %v13058_v44 }
 0x189   : > { %v13045_v27 = vrot.slane %v1136_v13, %v12967_v57  ;;  %v1151_v29 = vrot.slane %v1137_v14, %v12967_v57  ;;  %v13049_v31 = vrot.slane %v1152_v7, %v12967_v57  ;;  %v1167_v32 = vrot.slane %v1153_v18, %v12967_v57 }
 0x18a   : > { %v1416_v46 = vand.u32 4294901760, %v13054_v33  ;;  %v13092_v18 = vand.u32 4294901760, %v13062_v47 }
 0x18b   : > { %v1200_v34 = vcombine.low %v13045_v27, %v13049_v31  ;;  %v1216_v35 = vcombine.low %v1151_v29, %v1167_v32  ;;  %v1217_v37 = vcombine.high %v1151_v29, %v1167_v32 }
 0x18c   : > { %v1417_v8 = vsub.f32 %v13054_v33, %v1416_v46  ;;  %v1974_v39 = vsub.f32 %v13062_v47, %v13092_v18 }
 0x18d   : > { %v1208_v54 = vrot.slane %v1200_v34, %v12979_v26  ;;  %v13067_v36 = vrot.slane %v1216_v35, %v12979_v26  ;;  %v13070_v55 = vrot.slane %v1217_v37, %v12979_v26  ;;  %v13102_v35 = vand.u32 4294901760, %v13080_v10 }
 0x18e   : > { %v1418_v7 = vand.u32 4294901760, %v1417_v8 }
 0x18f   : > { %v1232_v9 = vcombine.low %v1176_v51, %v1208_v54  ;;  %v1236_v11 = vcombine.low %v13073_v56, %v13067_v36  ;;  %v1237_v13 = vcombine.high %v13073_v56, %v13067_v36  ;;  %v1238_v14 = vcombine.low %v13076_v58, %v13070_v55 }
 0x190   : > { %v1239_v1 = vcombine.high %v13076_v58, %v13070_v55  ;;  %11814 = vmatprep.mubr.f32.mxu0 %v1418_v7  ;;  %v1233_v48 = vcombine.high %v1176_v51, %v1208_v54  ;;  %v1975_v51 = vand.u32 4294901760, %v1974_v39  ;;  %v13473_v56 = vand.u32 4294901760, %v242_v52 }
 0x191   : > { %v1345_v3 = vsel %vm1340_vm1, %v1232_v9, 0  ;;  %v3885_v49 = vsel %vm1340_vm1, %v1237_v13, 0  ;;  %v241_v13 = vld [vmem:[%s14489_s3 + $0x60] sm:$0xff] }
 0x192   : > { %v13096_v29 = vand.u32 4294901760, %v1345_v3  ;;  %v13471_v36 = vand.u32 4294901760, %v3885_v49  ;;  %v4901_v50 = vsel %vm1340_vm1, %v1239_v1, 0 }
 0x193   : > { %v275_v25 = vpop.permute.xlu1 %274  ;;  %v13613_v55 = vand.u32 4294901760, %v4901_v50 }
 0x194   : > { %v375_v32 = vadd.f32 %v12884_v4, %v275_v25  ;;  %11822 = vmatmul.mubr.f32.vlgmr.msra.gmra.mxu1 %v13096_v29  ;;  %v1425_v34 = vsub.f32 %v1345_v3, %v13096_v29  ;;  %v1850_v4 = vsel %vm1340_vm1, %v1097_v20, 0  ;;  %v784_v20 = vpop.f32.mrf.mxu0 }
 0x195   : > { %11832 = vmatpush3.msra.mxu1 %v12923_v38  ;;  %11835 = vmatprep.mubr.f32.mxu1 %v1416_v46  ;;  %v13118_v54 = vand.u32 4294901760, %v1850_v4 }
 0x196   : > { %v494_v37 = vadd.f32 %v12888_v12, %v375_v32  ;;  %11833 = vmatprep.subr.mxu1 %v12935_v41  ;;  %v1426_v8 = vand.u32 4294901760, %v1425_v34  ;;  %v1981_v12 = vsub.f32 %v13080_v10, %v13102_v35  ;;  %v1853_v32 = vsel %vm1340_vm1, %v1233_v48, 0 }
 0x197   : > { %11834 = vmatpush3.msra.mxu1 %v12935_v41  ;;  %v1065_v48 = vcombine.high %v12984_v28, %v12988_v30  ;;  %v1201_v30 = vcombine.high %v13045_v27, %v13049_v31  ;;  %v1169_v27 = vcombine.high %v13026_v63, %v13029_v0 }
 0x198   : > { %v591_v9 = vadd.f32 %v12892_v6, %v494_v37  ;;  %v1427_v3 = vsub.f32 %v1425_v34, %v1426_v8  ;;  %11836 = vmatmul.mubr.f32.vlgmr.msra.gmra.mxu1 %v1426_v8  ;;  %11845 = vmatprep.subr.mxu1 %v12923_v38  ;;  %v234_v6 = vld [vmem:[%s14489_s3 + $0x28] sm:$0xff] }
 0x199   : > { %11846 = vmatpush3.msra.mxu1 %v12923_v38  ;;  %11849 = vmatprep.mubr.f32.mxu1 %v13037_v21  ;;  %v1982_v38 = vand.u32 4294901760, %v1981_v12  ;;  %v13127_v39 = vand.u32 4294901760, %v234_v6  ;;  %v13191_v31 = vrot.slane %v1201_v30, %v12979_v26 }
 0x19a   : > { %v682_v46 = vadd.f32 %v12896_v22, %v591_v9  ;;  %v1428_v7 = vand.u32 4294901760, %v1427_v3  ;;  %11847 = vmatprep.subr.mxu1 %v12935_v41  ;;  %v871_v22 = vpop.f32.mrf.mxu1  ;;  %v13130_v9 = vand.u32 4294901760, %v1853_v32  ;;  %v13133_v3 = vsub.f32 %v1850_v4, %v13118_v54 }
 0x19b   : > { %11848 = vmatpush3.msra.mxu1 %v12935_v41  ;;  %v233_v41 = vld [vmem:[%s14489_s3 + $0x20] sm:$0xff]  ;;  %v13146_v4 = vsub.f32 %v234_v6, %v13127_v39 }
 0x19c   : > { %v785_v37 = vadd.f32 %v784_v20, %v682_v46  ;;  %11815 = vmatmul.mubr.f32.vlgmr.msra.gmra.mxu0 %v1428_v7  ;;  %11850 = vmatmul.mubr.f32.vlgmr.msra.gmra.mxu1 %v13096_v29  ;;  %v13148_v12 = vand.u32 4294901760, %v233_v41  ;;  %v13155_v28 = vsub.f32 %v1853_v32, %v13130_v9  ;;  %v786_v32 = vpop.f32.mrf.mxu0 }
 0x19d   : > { %11859 = vmatprep.subr.mxu1 %v1975_v51  ;;  %11825 = vmatpush3.msra.mxu0 %v12933_v40  ;;  %v377_v40 = vadd.f32 %v12886_v5, %v275_v25  ;;  %v1924_v5 = vand.u32 4294901760, %v13133_v3 }
 0x19e   : > { %v872_v8 = vadd.f32 %v871_v22, %v785_v37  ;;  %11828 = vmatprep.mubr.f32.mxu0 %v13054_v33  ;;  %11860 = vmatpush3.msra.mxu1 %v1975_v51  ;;  %v1033_v33 = vcombine.high %v12977_v19, %v12974_v16  ;;  %v13171_v19 = vand.u32 4294901760, %v13146_v4  ;;  %v13174_v25 = vsub.f32 %v233_v41, %v13148_v12 }
 0x19f   : > { %11863 = vmatprep.mubr.f32.mxu1 %v13118_v54  ;;  %11826 = vmatprep.subr.mxu0 %v12942_v43  ;;  %v496_v16 = vadd.f32 %v12890_v15, %v377_v40  ;;  %v1934_v15 = vand.u32 4294901760, %v13155_v28  ;;  %v13201_v51 = vrot.slane %v1169_v27, %v12979_v26 }
 0x1a0   : > { %11861 = vmatprep.subr.mxu1 %v1982_v38  ;;  %11827 = vmatpush3.msra.mxu0 %v12942_v43  ;;  %v13152_v46 = vmax.f32 %v872_v8, 0.0  ;;  %v13161_v43 = vrot.slane %v1065_v48, %v12979_v26  ;;  %v2482_v0 = vsub.f32 %v13146_v4, %v13171_v19  ;;  %v236_v8 = vld [vmem:[%s14489_s3 + $0x38] sm:$0xff]  ;;  %v873_v48 = vpop.f32.mrf.mxu1 }
 0x1a1   : > { %11862 = vmatpush3.msra.mxu1 %v1982_v38  ;;  %11829 = vmatmul.mubr.f32.vlgmr.msra.gmra.mxu0 %v1425_v34  ;;  %v13177_v34 = vrot.slane %v1033_v33, %v12979_v26  ;;  %v593_v63 = vadd.f32 %v12894_v17, %v496_v16  ;;  %v1935_v7 = vsub.f32 %v13155_v28, %v1934_v15 }
 0x1a2   : > { %11838 = vmatprep.subr.mxu0 %v12939_v42  ;;  %11864 = vmatmul.mubr.f32.vlgmr.msra.gmra.mxu1 %v13130_v9  ;;  %v1234_v17 = vcombine.low %v13201_v51, %v13191_v31  ;;  %v2483_v22 = vand.u32 4294901760, %v2482_v0 }
 0x1a3   : > { %11873 = vmatprep.subr.mxu1 %v13039_v23  ;;  %11839 = vmatpush3.msra.mxu0 %v12939_v42  ;;  %v1925_v42 = vsub.f32 %v13133_v3, %v1924_v5  ;;  %v684_v20 = vadd.f32 %v12898_v24, %v593_v63  ;;  %v1936_v37 = vand.u32 4294901760, %v1935_v7 }
 0x1a4   : > { %11842 = vmatprep.mubr.f32.mxu0 %v13037_v21  ;;  %11874 = vmatpush3.msra.mxu1 %v13039_v23  ;;  %v1098_v21 = vcombine.low %v13177_v34, %v13161_v43  ;;  %v2361_v38 = vsel %vm1340_vm1, %v1234_v17, 0  ;;  %v238_v17 = vld [vmem:[%s14489_s3 + $0x48] sm:$0xff] }
 0x1a5   : > { %11877 = vmatprep.mubr.f32.mxu1 %v1924_v5  ;;  %890 = vrot.lane.b32.xlu1 %v13152_v46, %s12686_s30  ;;  %v1926_v6 = vand.u32 4294901760, %v1925_v42  ;;  %v787_v41 = vadd.f32 %v786_v32, %v684_v20  ;;  %v13241_v5 = vand.u32 4294901760, %v236_v8  ;;  %v13325_v32 = vand.u32 4294901760, %v238_v17 }
 0x1a6   : > { %884 = vrot.lane.b32.xlu0 %v13152_v46, %s12687_s6  ;;  %11840 = vmatprep.subr.mxu0 %v12953_v45 }
 0x1a7   : > { %11875 = vmatprep.subr.mxu1 %v13058_v44  ;;  %11841 = vmatpush3.msra.mxu0 %v12953_v45  ;;  %v13206_v45 = vand.u32 4294901760, %v13174_v25  ;;  %v874_v30 = vadd.f32 %v873_v48, %v787_v41  ;;  %v13259_v27 = vsub.f32 %v236_v8, %v13241_v5 }
 0x1a8   : > { %11876 = vmatpush3.msra.mxu1 %v13058_v44  ;;  %11843 = vmatmul.mubr.f32.vlgmr.msra.gmra.mxu0 %v13096_v29  ;;  %v2358_v29 = vsel %vm1340_vm1, %v1098_v21, 0 }
 0x1a9   : > { %11852 = vmatprep.subr.mxu0 %v13039_v23  ;;  %11878 = vmatmul.mubr.f32.vlgmr.msra.gmra.mxu1 %v1934_v15  ;;  %v13225_v24 = vand.u32 4294901760, %v2358_v29  ;;  %v13265_v42 = vmax.f32 %v874_v30, 0.0  ;;  %v13276_v21 = vand.u32 4294901760, %v13259_v27  ;;  %v240_v30 = vld [vmem:[%s14489_s3 + $0x58] sm:$0xff] }
 0x1aa   : > { %11887 = vmatprep.subr.mxu1 %v13039_v23  ;;  %11853 = vmatpush3.msra.mxu0 %v13039_v23 }
 0x1ab   : > { %11856 = vmatprep.mubr.f32.mxu0 %v1926_v6  ;;  %11888 = vmatpush3.msra.mxu1 %v13039_v23  ;;  %v2489_v23 = vsub.f32 %v13174_v25, %v13206_v45  ;;  %v13239_v33 = vsub.f32 %v2358_v29, %v13225_v24  ;;  %v2990_v6 = vsub.f32 %v13259_v27, %v13276_v21 }
 0x1ac   : > { %11891 = vmatprep.mubr.f32.mxu1 %v13118_v54  ;;  %902 = vrot.lane.b32.xlu1 %v13152_v46, %s12689_s8 }
 0x1ad   : > { %896 = vrot.lane.b32.xlu0 %v13152_v46, %s12688_s7  ;;  %11854 = vmatprep.subr.mxu0 %v13058_v44  ;;  %v2490_v40 = vand.u32 4294901760, %v2489_v23  ;;  %v2432_v16 = vand.u32 4294901760, %v13239_v33  ;;  %v13345_v23 = vsub.f32 %v238_v17, %v13325_v32 }
 0x1ae   : > { %11889 = vmatprep.subr.mxu1 %v13058_v44  ;;  %11855 = vmatpush3.msra.mxu0 %v13058_v44 }
 0x1af   : > { %11890 = vmatpush3.msra.mxu1 %v13058_v44  ;;  %11857 = vmatmul.mubr.f32.vlgmr.msra.gmra.mxu0 %v1936_v37  ;;  %v13236_v44 = vand.u32 4294901760, %v2361_v38  ;;  %v237_v37 = vld [vmem:[%s14489_s3 + $0x40] sm:$0xff]  ;;  %v13359_v41 = vand.u32 4294901760, %v13345_v23 }
 0x1b0   : > { %11866 = vmatprep.subr.mxu0 %v13062_v47  ;;  %11892 = vmatmul.mubr.f32.vlgmr.msra.gmra.mxu1 %v13130_v9 }
 0x1b1   : > { %11901 = vmatprep.subr.mxu1 %v2483_v22  ;;  %11867 = vmatpush3.msra.mxu0 %v13062_v47  ;;  %v235_v47 = vld [vmem:[%s14489_s3 + $0x30] sm:$0xff] }
 0x1b2   : > { %11870 = vmatprep.mubr.f32.mxu0 %v13133_v3  ;;  %11902 = vmatpush3.msra.mxu1 %v2483_v22  ;;  %v13255_v3 = vsub.f32 %v2361_v38, %v13236_v44  ;;  %v13261_v15 = vand.u32 4294901760, %v235_v47 }
 0x1b3   : > { %11905 = vmatprep.mubr.f32.mxu1 %v13225_v24  ;;  %914 = vrot.lane.b32.xlu1 %v13152_v46, %s12691_s10 }
 0x1b4   : > { %908 = vrot.lane.b32.xlu0 %v13152_v46, %s12690_s9  ;;  %11868 = vmatprep.subr.mxu0 %v13080_v10  ;;  %v13279_v63 = vsub.f32 %v235_v47, %v13261_v15 }
 0x1b5   : > { %11903 = vmatprep.subr.mxu1 %v2490_v40  ;;  %11869 = vmatpush3.msra.mxu0 %v13080_v10  ;;  %v2442_v10 = vand.u32 4294901760, %v13255_v3 }
 0x1b6   : > { %11904 = vmatpush3.msra.mxu1 %v2490_v40  ;;  %11871 = vmatmul.mubr.f32.vlgmr.msra.gmra.mxu0 %v13155_v28  ;;  %v2433_v28 = vsub.f32 %v13239_v33, %v2432_v16  ;;  %v13295_v7 = vand.u32 4294901760, %v13279_v63  ;;  %v3498_v40 = vsub.f32 %v13345_v23, %v13359_v41 }
 0x1b7   : > { %11880 = vmatprep.subr.mxu0 %v13092_v18  ;;  %11906 = vmatmul.mubr.f32.vlgmr.msra.gmra.mxu1 %v13236_v44  ;;  %v2443_v0 = vsub.f32 %v13255_v3, %v2442_v10 }
 0x1b8   : > { %11915 = vmatprep.subr.mxu1 %v13127_v39  ;;  %11881 = vmatpush3.msra.mxu0 %v13092_v18  ;;  %v1099_v18 = vcombine.high %v13177_v34, %v13161_v43  ;;  %v1235_v43 = vcombine.high %v13201_v51, %v13191_v31  ;;  %v2991_v34 = vand.u32 4294901760, %v2990_v6  ;;  %v2997_v31 = vsub.f32 %v13279_v63, %v13295_v7 }
 0x1b9   : > { %11884 = vmatprep.mubr.f32.mxu0 %v13118_v54  ;;  %11916 = vmatpush3.msra.mxu1 %v13127_v39  ;;  %v2434_v54 = vand.u32 4294901760, %v2433_v28 }
 0x1ba   : > { %11919 = vmatprep.mubr.f32.mxu1 %v2432_v16  ;;  %928 = vrot.lane.b32.xlu1 %v13265_v42, %s12687_s6  ;;  %v2869_v51 = vsel %vm1340_vm1, %v1235_v43, 0  ;;  %v2998_v29 = vand.u32 4294901760, %v2997_v31  ;;  %v3882_v31 = vsel %vm1340_vm1, %v1101_v60, 0 }
 0x1bb   : > { %920 = vrot.lane.b32.xlu0 %v13152_v46, %s12692_s11  ;;  %11882 = vmatprep.subr.mxu0 %v13102_v35  ;;  %v13323_v20 = vand.u32 4294901760, %v2869_v51 }
 0x1bc   : > { %11917 = vmatprep.subr.mxu1 %v13148_v12  ;;  %11883 = vmatpush3.msra.mxu0 %v13102_v35  ;;  %v2866_v35 = vsel %vm1340_vm1, %v1099_v18, 0 }
 0x1bd   : > { %11918 = vmatpush3.msra.mxu1 %v13148_v12  ;;  %11885 = vmatmul.mubr.f32.vlgmr.msra.gmra.mxu0 %v13130_v9  ;;  %v2444_v9 = vand.u32 4294901760, %v2443_v0  ;;  %v13342_v22 = vsub.f32 %v2869_v51, %v13323_v20 }
 0x1be   : > { %11894 = vmatprep.subr.mxu0 %v13127_v39  ;;  %11920 = vmatmul.mubr.f32.vlgmr.msra.gmra.mxu1 %v2442_v10  ;;  %v239_v10 = vld [vmem:[%s14489_s3 + $0x50] sm:$0xff] }
 0x1bf   : > { %11929 = vmatprep.subr.mxu1 %v13127_v39  ;;  %11895 = vmatpush3.msra.mxu0 %v13127_v39  ;;  %v2950_v8 = vand.u32 4294901760, %v13342_v22 }
 0x1c0   : > { %11898 = vmatprep.mubr.f32.mxu0 %v2434_v54  ;;  %11930 = vmatpush3.msra.mxu1 %v13127_v39  ;;  %v13313_v39 = vand.u32 4294901760, %v2866_v35 }
 0x1c1   : > { %11933 = vmatprep.mubr.f32.mxu1 %v13225_v24  ;;  %940 = vrot.lane.b32.xlu1 %v13265_v42, %s12688_s7 }
 0x1c2   : > { %934 = vrot.lane.b32.xlu0 %v13265_v42, %s12686_s30  ;;  %11896 = vmatprep.subr.mxu0 %v13148_v12 }
 0x1c3   : > { %11931 = vmatprep.subr.mxu1 %v13148_v12  ;;  %11897 = vmatpush3.msra.mxu0 %v13148_v12 }
 0x1c4   : > { %11932 = vmatpush3.msra.mxu1 %v13148_v12  ;;  %11899 = vmatmul.mubr.f32.vlgmr.msra.gmra.mxu0 %v2444_v9  ;;  %v2939_v12 = vsub.f32 %v2866_v35, %v13313_v39 }
 0x1c5   : > { %11908 = vmatprep.subr.mxu0 %v13146_v4  ;;  %11934 = vmatmul.mubr.f32.vlgmr.msra.gmra.mxu1 %v13236_v44 }
 0x1c6   : > { %11943 = vmatprep.subr.mxu1 %v2991_v34  ;;  %11909 = vmatpush3.msra.mxu0 %v13146_v4  ;;  %v13338_v4 = vand.u32 4294901760, %v237_v37  ;;  %v2940_v38 = vand.u32 4294901760, %v2939_v12 }
 0x1c7   : > { %11912 = vmatprep.mubr.f32.mxu0 %v13239_v33  ;;  %11944 = vmatpush3.msra.mxu1 %v2991_v34  ;;  %v3374_v33 = vsel %vm1340_vm1, %v1100_v59, 0  ;;  %v3377_v59 = vsel %vm1340_vm1, %v1236_v11, 0  ;;  %v13402_v11 = vand.u32 4294901760, %v240_v30 }
 0x1c8   : > { %11947 = vmatprep.mubr.f32.mxu1 %v13313_v39  ;;  %952 = vrot.lane.b32.xlu1 %v13265_v42, %s12690_s9  ;;  %v2941_v48 = vsub.f32 %v2939_v12, %v2940_v38  ;;  %v13400_v16 = vand.u32 4294901760, %v3377_v59 }
 0x1c9   : > { %946 = vrot.lane.b32.xlu0 %v13265_v42, %s12689_s8  ;;  %11910 = vmatprep.subr.mxu0 %v13174_v25  ;;  %v13419_v0 = vsub.f32 %v240_v30, %v13402_v11  ;;  %v243_v30 = vld [vmem:[%s14489_s3 + $0x70] sm:$0xff]  ;;  %s12696_s8 = smov 8  }
 0x1ca   : > { %11945 = vmatprep.subr.mxu1 %v2998_v29  ;;  %11911 = vmatpush3.msra.mxu0 %v13174_v25  ;;  %v13353_v25 = vsub.f32 %v237_v37, %v13338_v4  ;;  %v13416_v54 = vsub.f32 %v3377_v59, %v13400_v16  ;;  %v13487_v37 = vsub.f32 %v3885_v49, %v13471_v36 }
 0x1cb   : > { %11946 = vmatpush3.msra.mxu1 %v2998_v29  ;;  %11913 = vmatmul.mubr.f32.vlgmr.msra.gmra.mxu0 %v13255_v3  ;;  %v13432_v35 = vand.u32 4294901760, %v13419_v0 }
 0x1cc   : > { %11922 = vmatprep.subr.mxu0 %v13171_v19  ;;  %11948 = vmatmul.mubr.f32.vlgmr.msra.gmra.mxu1 %v13323_v20  ;;  %v3458_v43 = vand.u32 4294901760, %v13416_v54 }
 0x1cd   : > { %11957 = vmatprep.subr.mxu1 %v13241_v5  ;;  %11923 = vmatpush3.msra.mxu0 %v13171_v19  ;;  %v13369_v19 = vand.u32 4294901760, %v13353_v25  ;;  %v4006_v34 = vsub.f32 %v13419_v0, %v13432_v35 }
 0x1ce   : > { %11926 = vmatprep.mubr.f32.mxu0 %v13225_v24  ;;  %11958 = vmatpush3.msra.mxu1 %v13241_v5  ;;  %v2951_v24 = vsub.f32 %v13342_v22, %v2950_v8 }
 0x1cf   : > { %11961 = vmatprep.mubr.f32.mxu1 %v2940_v38  ;;  %964 = vrot.lane.b32.xlu1 %v13265_v42, %s12692_s11  ;;  %v3505_v47 = vsub.f32 %v13353_v25, %v13369_v19  ;;  %v4007_v17 = vand.u32 4294901760, %v4006_v34  ;;  %v246_v34 = vld [vmem:[%s14489_s3 + $0x88] sm:$0xff] }
 0x1d0   : > { %958 = vrot.lane.b32.xlu0 %v13265_v42, %s12691_s10  ;;  %11924 = vmatprep.subr.mxu0 %v13206_v45  ;;  %v2952_v3 = vand.u32 4294901760, %v2951_v24  ;;  %v4390_v24 = vsel %vm1340_vm1, %v1102_v61, 0  ;;  %v4393_v61 = vsel %vm1340_vm1, %v1238_v14, 0 }
 0x1d1   : > { %11959 = vmatprep.subr.mxu1 %v13261_v15  ;;  %11925 = vmatpush3.msra.mxu0 %v13206_v45  ;;  %v2942_v45 = vand.u32 4294901760, %v2941_v48  ;;  %v3506_v28 = vand.u32 4294901760, %v3505_v47  ;;  %v13542_v59 = vand.u32 4294901760, %v4393_v61 }
 0x1d2   : > { %11960 = vmatpush3.msra.mxu1 %v13261_v15  ;;  %11927 = vmatmul.mubr.f32.vlgmr.msra.gmra.mxu0 %v13236_v44  ;;  %v13384_v44 = vand.u32 4294901760, %v3374_v33 }
 0x1d3   : > { %11936 = vmatprep.subr.mxu0 %v13241_v5  ;;  %11962 = vmatmul.mubr.f32.vlgmr.msra.gmra.mxu1 %v2950_v8 }
 0x1d4   : > { %11971 = vmatprep.subr.mxu1 %v13241_v5  ;;  %11937 = vmatpush3.msra.mxu0 %v13241_v5  ;;  %v3447_v18 = vsub.f32 %v3374_v33, %v13384_v44 }
 0x1d5   : > { %11940 = vmatprep.mubr.f32.mxu0 %v2942_v45  ;;  %11972 = vmatpush3.msra.mxu1 %v13241_v5  ;;  %v3499_v5 = vand.u32 4294901760, %v3498_v40  ;;  %v13526_v40 = vand.u32 4294901760, %v4390_v24  ;;  %v244_v45 = vld [vmem:[%s14489_s3 + $0x78] sm:$0xff] }
 0x1d6   : > { %11975 = vmatprep.mubr.f32.mxu1 %v13313_v39  ;;  %11938 = vmatprep.subr.mxu0 %v13261_v15  ;;  %v3448_v6 = vand.u32 4294901760, %v3447_v18  ;;  %v13544_v14 = vand.u32 4294901760, %v244_v45 }
 0x1d7   : > { %11973 = vmatprep.subr.mxu1 %v13261_v15  ;;  %11939 = vmatpush3.msra.mxu0 %v13261_v15 }
 0x1d8   : > { %11974 = vmatpush3.msra.mxu1 %v13261_v15  ;;  %11941 = vmatmul.mubr.f32.vlgmr.msra.gmra.mxu0 %v2952_v3  ;;  %v13411_v15 = vand.u32 4294901760, %v239_v10 }
 0x1d9   : > { %11950 = vmatprep.subr.mxu0 %v13259_v27  ;;  %11976 = vmatmul.mubr.f32.vlgmr.msra.gmra.mxu1 %v13323_v20 }
 0x1da   : > { %11985 = vmatprep.subr.mxu1 %v3499_v5  ;;  %11951 = vmatpush3.msra.mxu0 %v13259_v27  ;;  %v13426_v27 = vsub.f32 %v239_v10, %v13411_v15  ;;  %v13561_v10 = vsub.f32 %v244_v45, %v13544_v14 }
 0x1db   : > { %11954 = vmatprep.mubr.f32.mxu0 %v2939_v12  ;;  %11986 = vmatpush3.msra.mxu1 %v3499_v5  ;;  %v13490_v12 = vsub.f32 %v242_v52, %v13473_v56  ;;  %v4463_v5 = vsub.f32 %v4390_v24, %v13526_v40 }
 0x1dc   : > { %11989 = vmatprep.mubr.f32.mxu1 %v13384_v44  ;;  %11952 = vmatprep.subr.mxu0 %v13279_v63  ;;  %v13440_v9 = vand.u32 4294901760, %v13426_v27 }
 0x1dd   : > { %11987 = vmatprep.subr.mxu1 %v3506_v28  ;;  %11953 = vmatpush3.msra.mxu0 %v13279_v63  ;;  %v3449_v63 = vsub.f32 %v3447_v18, %v3448_v6  ;;  %v13503_v38 = vand.u32 4294901760, %v13490_v12 }
 0x1de   : > { %11988 = vmatpush3.msra.mxu1 %v3506_v28  ;;  %11955 = vmatmul.mubr.f32.vlgmr.msra.gmra.mxu0 %v13342_v22  ;;  %v4013_v51 = vsub.f32 %v13426_v27, %v13440_v9  ;;  %v4464_v28 = vand.u32 4294901760, %v4463_v5 }
 0x1df   : > { %11964 = vmatprep.subr.mxu0 %v13276_v21  ;;  %11990 = vmatmul.mubr.f32.vlgmr.msra.gmra.mxu1 %v13400_v16  ;;  %v4514_v48 = vsub.f32 %v13490_v12, %v13503_v38 }
 0x1e0   : > { %11999 = vmatprep.subr.mxu1 %v13325_v32  ;;  %11965 = vmatpush3.msra.mxu0 %v13276_v21  ;;  %v3459_v21 = vsub.f32 %v13416_v54, %v3458_v43  ;;  %v4014_v29 = vand.u32 4294901760, %v4013_v51 }
 0x1e1   : > { %11968 = vmatprep.mubr.f32.mxu0 %v13313_v39  ;;  %12000 = vmatpush3.msra.mxu1 %v13325_v32  ;;  %v13455_v39 = vand.u32 4294901760, %v3882_v31  ;;  %v4515_v47 = vand.u32 4294901760, %v4514_v48 }
 0x1e2   : > { %12003 = vmatprep.mubr.f32.mxu1 %v3448_v6  ;;  %11966 = vmatprep.subr.mxu0 %v13295_v7  ;;  %v3460_v60 = vand.u32 4294901760, %v3459_v21 }
 0x1e3   : > { %12001 = vmatprep.subr.mxu1 %v13338_v4  ;;  %11967 = vmatpush3.msra.mxu0 %v13295_v7  ;;  %v3450_v7 = vand.u32 4294901760, %v3449_v63 }
 0x1e4   : > { %12002 = vmatpush3.msra.mxu1 %v13338_v4  ;;  %11969 = vmatmul.mubr.f32.vlgmr.msra.gmra.mxu0 %v13323_v20  ;;  %v3955_v20 = vsub.f32 %v3882_v31, %v13455_v39  ;;  %v13618_v31 = vand.u32 4294901760, %v246_v34 }
 0x1e5   : > { %11978 = vmatprep.subr.mxu0 %v13325_v32  ;;  %12004 = vmatmul.mubr.f32.vlgmr.msra.gmra.mxu1 %v3458_v43 }
 0x1e6   : > { %12013 = vmatprep.subr.mxu1 %v13325_v32  ;;  %11979 = vmatpush3.msra.mxu0 %v13325_v32  ;;  %v13629_v49 = vsub.f32 %v246_v34, %v13618_v31  ;;  %v248_v34 = vld [vmem:[%s14489_s3 + $0x98] sm:$0xff] }
 0x1e7   : > { %11982 = vmatprep.mubr.f32.mxu0 %v3450_v7  ;;  %12014 = vmatpush3.msra.mxu1 %v13325_v32  ;;  %v13482_v32 = vand.u32 4294901760, %v241_v13  ;;  %v245_v7 = vld [vmem:[%s14489_s3 + $0x80] sm:$0xff] }
 0x1e8   : > { %12017 = vmatprep.mubr.f32.mxu1 %v13384_v44  ;;  %11980 = vmatprep.subr.mxu0 %v13338_v4  ;;  %v13631_v52 = vand.u32 4294901760, %v245_v7 }
 0x1e9   : > { %12015 = vmatprep.subr.mxu1 %v13338_v4  ;;  %11981 = vmatpush3.msra.mxu0 %v13338_v4  ;;  %v13497_v22 = vsub.f32 %v241_v13, %v13482_v32 }
 0x1ea   : > { %12016 = vmatpush3.msra.mxu1 %v13338_v4  ;;  %11983 = vmatmul.mubr.f32.vlgmr.msra.gmra.mxu0 %v3460_v60  ;;  %v3956_v4 = vand.u32 4294901760, %v3955_v20 }
 0x1eb   : > { %11992 = vmatprep.subr.mxu0 %v13345_v23  ;;  %12018 = vmatmul.mubr.f32.vlgmr.msra.gmra.mxu1 %v13400_v16  ;;  %v13511_v8 = vand.u32 4294901760, %v13497_v22 }
 0x1ec   : > { %12027 = vmatprep.subr.mxu1 %v4007_v17  ;;  %11993 = vmatpush3.msra.mxu0 %v13345_v23  ;;  %v3966_v23 = vand.u32 4294901760, %v13487_v37 }
 0x1ed   : > { %11996 = vmatprep.mubr.f32.mxu0 %v3447_v18  ;;  %12028 = vmatpush3.msra.mxu1 %v4007_v17  ;;  %v4521_v33 = vsub.f32 %v13497_v22, %v13511_v8 }
 0x1ee   : > { %12031 = vmatprep.mubr.f32.mxu1 %v13455_v39  ;;  %11994 = vmatprep.subr.mxu0 %v13353_v25 }
 0x1ef   : > { %12029 = vmatprep.subr.mxu1 %v4014_v29  ;;  %11995 = vmatpush3.msra.mxu0 %v13353_v25  ;;  %v3957_v25 = vsub.f32 %v3955_v20, %v3956_v4  ;;  %v4522_v3 = vand.u32 4294901760, %v4521_v33 }
 0x1f0   : > { %12030 = vmatpush3.msra.mxu1 %v4014_v29  ;;  %11997 = vmatmul.mubr.f32.vlgmr.msra.gmra.mxu0 %v13416_v54  ;;  %v13574_v54 = vand.u32 4294901760, %v13561_v10 }
 0x1f1   : > { %12006 = vmatprep.subr.mxu0 %v13359_v41  ;;  %12032 = vmatmul.mubr.f32.vlgmr.msra.gmra.mxu1 %v13471_v36 }
 0x1f2   : > { %12041 = vmatprep.subr.mxu1 %v13402_v11  ;;  %12007 = vmatpush3.msra.mxu0 %v13359_v41  ;;  %v3967_v41 = vsub.f32 %v13487_v37, %v3966_v23  ;;  %v5022_v43 = vsub.f32 %v13561_v10, %v13574_v54 }
 0x1f3   : > { %12010 = vmatprep.mubr.f32.mxu0 %v13384_v44  ;;  %12042 = vmatpush3.msra.mxu1 %v13402_v11 }
 0x1f4   : > { %12045 = vmatprep.mubr.f32.mxu1 %v3956_v4  ;;  %12008 = vmatprep.subr.mxu0 %v13369_v19  ;;  %v3968_v44 = vand.u32 4294901760, %v3967_v41 }
 0x1f5   : > { %12043 = vmatprep.subr.mxu1 %v13411_v15  ;;  %12009 = vmatpush3.msra.mxu0 %v13369_v19  ;;  %v3958_v19 = vand.u32 4294901760, %v3957_v25 }
 0x1f6   : > { %12044 = vmatpush3.msra.mxu1 %v13411_v15  ;;  %12011 = vmatmul.mubr.f32.vlgmr.msra.gmra.mxu0 %v13400_v16  ;;  %v13553_v16 = vand.u32 4294901760, %v243_v30 }
 0x1f7   : > { %12020 = vmatprep.subr.mxu0 %v13402_v11  ;;  %12046 = vmatmul.mubr.f32.vlgmr.msra.gmra.mxu1 %v3966_v23 }
 0x1f8   : > { %12055 = vmatprep.subr.mxu1 %v13402_v11  ;;  %12021 = vmatpush3.msra.mxu0 %v13402_v11  ;;  %v13568_v18 = vsub.f32 %v243_v30, %v13553_v16 }
 0x1f9   : > { %12024 = vmatprep.mubr.f32.mxu0 %v3958_v19  ;;  %12056 = vmatpush3.msra.mxu1 %v13402_v11  ;;  %v13558_v11 = vsub.f32 %v4393_v61, %v13542_v59 }
 0x1fa   : > { %12059 = vmatprep.mubr.f32.mxu1 %v13455_v39  ;;  %12022 = vmatprep.subr.mxu0 %v13411_v15  ;;  %v13582_v6 = vand.u32 4294901760, %v13568_v18 }
 0x1fb   : > { %12057 = vmatprep.subr.mxu1 %v13411_v15  ;;  %12023 = vmatpush3.msra.mxu0 %v13411_v15 }
 0x1fc   : > { %12058 = vmatpush3.msra.mxu1 %v13411_v15  ;;  %12025 = vmatmul.mubr.f32.vlgmr.msra.gmra.mxu0 %v3968_v44  ;;  %v4474_v15 = vand.u32 4294901760, %v13558_v11  ;;  %v5029_v21 = vsub.f32 %v13568_v18, %v13582_v6 }
 0x1fd   : > { %12034 = vmatprep.subr.mxu0 %v13419_v0  ;;  %12060 = vmatmul.mubr.f32.vlgmr.msra.gmra.mxu1 %v13471_v36 }
 0x1fe   : > { %12069 = vmatprep.subr.mxu1 %v4515_v47  ;;  %12035 = vmatpush3.msra.mxu0 %v13419_v0  ;;  %v4465_v0 = vsub.f32 %v4463_v5, %v4464_v28  ;;  %v5030_v58 = vand.u32 4294901760, %v5029_v21 }
 0x1ff   : > { %12038 = vmatprep.mubr.f32.mxu0 %v3955_v20  ;;  %12070 = vmatpush3.msra.mxu1 %v4515_v47 }
 0x200   : > { %12073 = vmatprep.mubr.f32.mxu1 %v13526_v40  ;;  %12036 = vmatprep.subr.mxu0 %v13426_v27  ;;  %v4466_v63 = vand.u32 4294901760, %v4465_v0 }
 0x201   : > { %12071 = vmatprep.subr.mxu1 %v4522_v3  ;;  %12037 = vmatpush3.msra.mxu0 %v13426_v27  ;;  %v4475_v27 = vsub.f32 %v13558_v11, %v4474_v15 }
 0x202   : > { %12072 = vmatpush3.msra.mxu1 %v4522_v3  ;;  %12039 = vmatmul.mubr.f32.vlgmr.msra.gmra.mxu0 %v13487_v37 }
 0x203   : > { %12048 = vmatprep.subr.mxu0 %v13432_v35  ;;  %12074 = vmatmul.mubr.f32.vlgmr.msra.gmra.mxu1 %v13542_v59  ;;  %v4476_v53 = vand.u32 4294901760, %v4475_v27 }
 0x204   : > { %12083 = vmatprep.subr.mxu1 %v13473_v56  ;;  %12049 = vmatpush3.msra.mxu0 %v13432_v35  ;;  %v4898_v35 = vsel %vm1340_vm1, %v1103_v62, 0  ;;  %v5023_v62 = vand.u32 4294901760, %v5022_v43 }
 0x205   : > { %12052 = vmatprep.mubr.f32.mxu0 %v13455_v39  ;;  %12084 = vmatpush3.msra.mxu1 %v13473_v56  ;;  %v4981_v39 = vsub.f32 %v4901_v50, %v13613_v55 }
 0x206   : > { %12087 = vmatprep.mubr.f32.mxu1 %v4464_v28  ;;  %12050 = vmatprep.subr.mxu0 %v13440_v9 }
 0x207   : > { %12085 = vmatprep.subr.mxu1 %v13482_v32  ;;  %12051 = vmatpush3.msra.mxu0 %v13440_v9  ;;  %v13597_v9 = vand.u32 4294901760, %v4898_v35  ;;  %v4982_v60 = vand.u32 4294901760, %v4981_v39 }
 0x208   : > { %12086 = vmatpush3.msra.mxu1 %v13482_v32  ;;  %12053 = vmatmul.mubr.f32.vlgmr.msra.gmra.mxu0 %v13471_v36  ;;  %v13641_v36 = vand.u32 4294901760, %v13629_v49 }
 0x209   : > { %12062 = vmatprep.subr.mxu0 %v13473_v56  ;;  %12088 = vmatmul.mubr.f32.vlgmr.msra.gmra.mxu1 %v4474_v15  ;;  %v4971_v1 = vsub.f32 %v4898_v35, %v13597_v9  ;;  %v4983_v13 = vsub.f32 %v4981_v39, %v4982_v60 }
 0x20a   : > { %12097 = vmatprep.subr.mxu1 %v13473_v56  ;;  %12063 = vmatpush3.msra.mxu0 %v13473_v56 }
 0x20b   : > { %12066 = vmatprep.mubr.f32.mxu0 %v4466_v63  ;;  %12098 = vmatpush3.msra.mxu1 %v13473_v56  ;;  %v4972_v51 = vand.u32 4294901760, %v4971_v1  ;;  %v13644_v56 = vsub.f32 %v245_v7, %v13631_v52  ;;  %v4984_v4 = vand.u32 4294901760, %v4983_v13  ;;  %v13708_v7 = vand.u32 4294901760, %v248_v34 }
 0x20c   : > { %12101 = vmatprep.mubr.f32.mxu1 %v13526_v40  ;;  %12064 = vmatprep.subr.mxu0 %v13482_v32 }
 0x20d   : > { %12099 = vmatprep.subr.mxu1 %v13482_v32  ;;  %12065 = vmatpush3.msra.mxu0 %v13482_v32  ;;  %v4973_v17 = vsub.f32 %v4971_v1, %v4972_v51  ;;  %v13655_v37 = vand.u32 4294901760, %v13644_v56 }
 0x20e   : > { %12100 = vmatpush3.msra.mxu1 %v13482_v32  ;;  %12067 = vmatmul.mubr.f32.vlgmr.msra.gmra.mxu0 %v4476_v53  ;;  %v5530_v32 = vsub.f32 %v13629_v49, %v13641_v36 }
 0x20f   : > { %12076 = vmatprep.subr.mxu0 %v13490_v12  ;;  %12102 = vmatmul.mubr.f32.vlgmr.msra.gmra.mxu1 %v13542_v59  ;;  %v4974_v29 = vand.u32 4294901760, %v4973_v17  ;;  %v5537_v23 = vsub.f32 %v13644_v56, %v13655_v37 }
 0x210   : > { %12111 = vmatprep.subr.mxu1 %v5023_v62  ;;  %12077 = vmatpush3.msra.mxu0 %v13490_v12 }
 0x211   : > { %12080 = vmatprep.mubr.f32.mxu0 %v4463_v5  ;;  %12112 = vmatpush3.msra.mxu1 %v5023_v62 }
 0x212   : > { %12115 = vmatprep.mubr.f32.mxu1 %v13597_v9  ;;  %12078 = vmatprep.subr.mxu0 %v13497_v22 }
 0x213   : > { %12113 = vmatprep.subr.mxu1 %v5030_v58  ;;  %12079 = vmatpush3.msra.mxu0 %v13497_v22  ;;  %v5531_v22 = vand.u32 4294901760, %v5530_v32 }
 0x214   : > { %12114 = vmatpush3.msra.mxu1 %v5030_v58  ;;  %12081 = vmatmul.mubr.f32.vlgmr.msra.gmra.mxu0 %v13558_v11 }
 0x215   : > { %12090 = vmatprep.subr.mxu0 %v13503_v38  ;;  %12116 = vmatmul.mubr.f32.vlgmr.msra.gmra.mxu1 %v13613_v55 }
 0x216   : > { %12125 = vmatprep.subr.mxu1 %v13544_v14  ;;  %12091 = vmatpush3.msra.mxu0 %v13503_v38 }
 0x217   : > { %12094 = vmatprep.mubr.f32.mxu0 %v13526_v40  ;;  %12126 = vmatpush3.msra.mxu1 %v13544_v14  ;;  %v891_v12 = vpop.permute.xlu1 %890 }
 0x218   : > { %12129 = vmatprep.mubr.f32.mxu1 %v4972_v51  ;;  %12092 = vmatprep.subr.mxu0 %v13511_v8  ;;  %v885_v20 = vpop.permute.xlu0 %884  ;;  %v1240_v19 = vcombine.low %v13152_v46, %v891_v12 }
 0x219   : > { %12127 = vmatprep.subr.mxu1 %v13553_v16  ;;  %12093 = vmatpush3.msra.mxu0 %v13511_v8  ;;  %v5538_v8 = vand.u32 4294901760, %v5537_v23 }
 0x21a   : > { %12128 = vmatpush3.msra.mxu1 %v13553_v16  ;;  %12095 = vmatmul.mubr.f32.vlgmr.msra.gmra.mxu0 %v13542_v59  ;;  %v1247_v45 = vrot.slane %v1240_v19, %v12967_v57 }
 0x21b   : > { %12104 = vmatprep.subr.mxu0 %v13544_v14  ;;  %12130 = vmatmul.mubr.f32.vlgmr.msra.gmra.mxu1 %v4982_v60 }
 0x21c   : > { %12139 = vmatprep.subr.mxu1 %v13544_v14  ;;  %12105 = vmatpush3.msra.mxu0 %v13544_v14 }
 0x21d   : > { %12108 = vmatprep.mubr.f32.mxu0 %v4974_v29  ;;  %12140 = vmatpush3.msra.mxu1 %v13544_v14  ;;  %v13718_v29 = vsub.f32 %v248_v34, %v13708_v7 }
 0x21e   : > { %12143 = vmatprep.mubr.f32.mxu1 %v13597_v9  ;;  %12106 = vmatprep.subr.mxu0 %v13553_v16  ;;  %v903_v25 = vpop.permute.xlu1 %902 }
 0x21f   : > { %12141 = vmatprep.subr.mxu1 %v13553_v16  ;;  %12107 = vmatpush3.msra.mxu0 %v13553_v16  ;;  %v897_v38 = vpop.permute.xlu0 %896 }
 0x220   : > { %12142 = vmatpush3.msra.mxu1 %v13553_v16  ;;  %12109 = vmatmul.mubr.f32.vlgmr.msra.gmra.mxu0 %v4984_v4  ;;  %v1248_v48 = vcombine.low %v885_v20, %v897_v38 }
 0x221   : > { %12118 = vmatprep.subr.mxu0 %v13561_v10  ;;  %12144 = vmatmul.mubr.f32.vlgmr.msra.gmra.mxu1 %v13613_v55 }
 0x222   : > { %12119 = vmatpush3.msra.mxu0 %v13561_v10  ;;  %12122 = vmatprep.mubr.f32.mxu0 %v4971_v1  ;;  %v1255_v40 = vrot.slane %v1248_v48, %v12967_v57 }
 0x223   : > { %12120 = vmatprep.subr.mxu0 %v13568_v18  ;;  %12153 = vmatprep.subr.mxu1 %v5531_v22 }
 0x224   : > { %12121 = vmatpush3.msra.mxu0 %v13568_v18  ;;  %12154 = vmatpush3.msra.mxu1 %v5531_v22  ;;  %v1272_v59 = vcombine.low %v1247_v45, %v1255_v40  ;;  %v13725_v22 = vand.u32 4294901760, %v13718_v29 }
 0x225   : > { %12123 = vmatmul.mubr.f32.vlgmr.msra.gmra.mxu0 %v4981_v39  ;;  %12132 = vmatprep.subr.mxu0 %v13574_v54  ;;  %v915_v24 = vpop.permute.xlu1 %914  ;;  %v247_v39 = vld [vmem:[%s14489_s3 + $0x90] sm:$0xff] }
 0x226   : > { %12133 = vmatpush3.msra.mxu0 %v13574_v54  ;;  %12136 = vmatprep.mubr.f32.mxu0 %v13597_v9  ;;  %v909_v41 = vpop.permute.xlu0 %908  ;;  %v1256_v33 = vcombine.low %v903_v25, %v915_v24  ;;  %v1279_v3 = vrot.slane %v1272_v59, %v12979_v26  ;;  %v13713_v60 = vand.u32 4294901760, %v247_v39 }
 0x227   : > { %12134 = vmatprep.subr.mxu0 %v13582_v6  ;;  %12155 = vmatprep.subr.mxu1 %v5538_v8 }
 0x228   : > { %12135 = vmatpush3.msra.mxu0 %v13582_v6  ;;  %12156 = vmatpush3.msra.mxu1 %v5538_v8  ;;  %v1263_v46 = vrot.slane %v1256_v33, %v12967_v57  ;;  %v13721_v32 = vsub.f32 %v247_v39, %v13713_v60 }
 0x229   : > { %12137 = vmatmul.mubr.f32.vlgmr.msra.gmra.mxu0 %v13613_v55  ;;  %12167 = vmatprep.subr.mxu1 %v13618_v31 }
 0x22a   : > { %12146 = vmatprep.subr.mxu0 %v13618_v31  ;;  %v13732_v8 = vand.u32 4294901760, %v13721_v32 }
 0x22b   : > { %12147 = vmatpush3.msra.mxu0 %v13618_v31 }
 0x22c   : > { %12148 = vmatprep.subr.mxu0 %v13631_v52  ;;  %v929_v47 = vpop.permute.xlu1 %928  ;;  %v6045_v33 = vsub.f32 %v13721_v32, %v13732_v8 }
 0x22d   : > { %v921_v61 = vpop.permute.xlu0 %920  ;;  %12149 = vmatpush3.msra.mxu0 %v13631_v52 }
 0x22e   : > { %v1264_v44 = vcombine.low %v909_v41, %v921_v61  ;;  %12160 = vmatprep.subr.mxu0 %v13629_v49  ;;  %v6038_v41 = vsub.f32 %v13718_v29, %v13725_v22 }
 0x230   : > { %v1271_v14 = vrot.slane %v1264_v44, %v12967_v57  ;;  %v6039_v44 = vand.u32 4294901760, %v6038_v41 }
 0x232   : > { %v1280_v30 = vcombine.low %v1263_v46, %v1271_v14  ;;  %v6046_v14 = vand.u32 4294901760, %v6045_v33 }
 0x233   : > { %v941_v16 = vpop.permute.xlu1 %940 }
 0x234   : > { %v1287_v5 = vrot.slane %v1280_v30, %v12979_v26  ;;  %v935_v10 = vpop.permute.xlu0 %934  ;;  %v1298_v6 = vcombine.low %v929_v47, %v941_v16 }
 0x235   : > { %v1290_v27 = vcombine.low %v13265_v42, %v935_v10 }
 0x236   : > { %v1288_v11 = vcombine.low %v1279_v3, %v1287_v5  ;;  %v1305_v63 = vrot.slane %v1298_v6, %v12967_v57  ;;  %v1289_v12 = vcombine.high %v1279_v3, %v1287_v5 }
 0x237   : > { %v1297_v9 = vrot.slane %v1290_v27, %v12967_v57 }
 0x238   : > { %v5406_v28 = vsel %vm1340_vm1, %v1288_v11, 0  ;;  %v5914_v48 = vsel %vm1340_vm1, %v1289_v12, 0 }
 0x239   : > { %v13692_v18 = vand.u32 4294901760, %v5406_v28  ;;  %v1322_v58 = vcombine.low %v1297_v9, %v1305_v63  ;;  %v13741_v40 = vand.u32 4294901760, %v5914_v48 }
 0x23a   : > { %v953_v15 = vpop.permute.xlu1 %952 }
 0x23b   : > { %12157 = vmatprep.mubr.f32.mxu1 %v13692_v18  ;;  %v13696_v54 = vsub.f32 %v5406_v28, %v13692_v18  ;;  %v947_v0 = vpop.permute.xlu0 %946  ;;  %v1329_v17 = vrot.slane %v1322_v58, %v12979_v26  ;;  %v13754_v30 = vsub.f32 %v5914_v48, %v13741_v40 }
 0x23d   : > { %v5480_v43 = vand.u32 4294901760, %v13696_v54  ;;  %v5988_v5 = vand.u32 4294901760, %v13754_v30 }
 0x23f   : > { %v5481_v35 = vsub.f32 %v13696_v54, %v5480_v43 }
 0x241   : > { %v965_v21 = vpop.permute.xlu1 %964  ;;  %v5482_v50 = vand.u32 4294901760, %v5481_v35 }
 0x242   : > { %v1314_v53 = vcombine.low %v953_v15, %v965_v21  ;;  %v959_v62 = vpop.permute.xlu0 %958 }
 0x243   : > { %v1306_v55 = vcombine.low %v947_v0, %v959_v62  ;;  %12150 = vmatprep.mubr.f32.mxu0 %v5482_v50 }
 0x244   : > { %v1321_v42 = vrot.slane %v1314_v53, %v12967_v57 }
 0x245   : > { %v1313_v1 = vrot.slane %v1306_v55, %v12967_v57 }
 0x247   : > { %v1330_v51 = vcombine.low %v1313_v1, %v1321_v42 }
 0x249   : > { %v1337_v13 = vrot.slane %v1330_v51, %v12979_v26 }
 0x24b   : > { %v1338_v20 = vcombine.low %v1329_v17, %v1337_v13  ;;  %v1339_v38 = vcombine.high %v1329_v17, %v1337_v13 }
 0x24d   : > { %v5409_v4 = vsel %vm1340_vm1, %v1338_v20, 0  ;;  %v5917_v61 = vsel %vm1340_vm1, %v1339_v38, 0 }
 0x24e   : > { %v13727_v23 = vand.u32 4294901760, %v5409_v4  ;;  %v13750_v46 = vand.u32 4294901760, %v5917_v61 }
 0x250   : > { %v5489_v25 = vsub.f32 %v5409_v4, %v13727_v23  ;;  %12158 = vmatmul.mubr.f32.vlgmr.msra.gmra.mxu1 %v13727_v23 }
 0x251   : > { %12168 = vmatpush3.msra.mxu1 %v13618_v31  ;;  %12171 = vmatprep.mubr.f32.mxu1 %v5480_v43 }
 0x252   : > { %12169 = vmatprep.subr.mxu1 %v13631_v52  ;;  %v5490_v24 = vand.u32 4294901760, %v5489_v25 }
 0x253   : > { %12170 = vmatpush3.msra.mxu1 %v13631_v52 }
 0x254   : > { %12172 = vmatmul.mubr.f32.vlgmr.msra.gmra.mxu1 %v5490_v24  ;;  %12181 = vmatprep.subr.mxu1 %v13618_v31  ;;  %v5491_v19 = vsub.f32 %v5489_v25, %v5490_v24  ;;  %v11823_v45 = vpop.f32.mrf.mxu1 }
 0x255   : > { %12182 = vmatpush3.msra.mxu1 %v13618_v31  ;;  %12185 = vmatprep.mubr.f32.mxu1 %v13692_v18 }
 0x256   : > { %12183 = vmatprep.subr.mxu1 %v13631_v52  ;;  %v5492_v47 = vand.u32 4294901760, %v5491_v19  ;;  %v1511_v59 = vpop.f32.mrf.mxu1 }
 0x257   : > { %12184 = vmatpush3.msra.mxu1 %v13631_v52  ;;  %v13761_v52 = vsub.f32 %v5917_v61, %v13750_v46 }
 0x258   : > { %12151 = vmatmul.mubr.f32.vlgmr.msra.gmra.mxu0 %v5492_v47  ;;  %12186 = vmatmul.mubr.f32.vlgmr.msra.gmra.mxu1 %v13727_v23  ;;  %v11837_v3 = vpop.f32.mrf.mxu1 }
 0x259   : > { %12195 = vmatprep.subr.mxu1 %v6039_v44  ;;  %12161 = vmatpush3.msra.mxu0 %v13629_v49  ;;  %v249_v49 = vld [vmem:[%s14490_s4] sm:$0xff] }
 0x25a   : > { %12164 = vmatprep.mubr.f32.mxu0 %v13696_v54  ;;  %12196 = vmatpush3.msra.mxu1 %v6039_v44  ;;  %v1675_v31 = vpop.f32.mrf.mxu1  ;;  %v6422_v15 = vsel %vm1340_vm1, %v249_v49, 0  ;;  %v5989_v54 = vsub.f32 %v13754_v30, %v5988_v5 }
 0x25b   : > { %12199 = vmatprep.mubr.f32.mxu1 %v13741_v40  ;;  %12162 = vmatprep.subr.mxu0 %v13644_v56  ;;  %v13782_v35 = vand.u32 4294901760, %v6422_v15 }
 0x25c   : > { %12197 = vmatprep.subr.mxu1 %v6046_v14  ;;  %12163 = vmatpush3.msra.mxu0 %v13644_v56  ;;  %v11816_v16 = vpop.f32.mrf.mxu0  ;;  %v11851_v11 = vpop.f32.mrf.mxu1  ;;  %v5998_v56 = vand.u32 4294901760, %v13761_v52  ;;  %v5990_v9 = vand.u32 4294901760, %v5989_v54 }
 0x25d   : > { %12198 = vmatpush3.msra.mxu1 %v6046_v14  ;;  %12165 = vmatmul.mubr.f32.vlgmr.msra.gmra.mxu0 %v5489_v25  ;;  %v1518_v0 = vadd.f32 %v11823_v45, %v11816_v16  ;;  %v13794_v53 = vsub.f32 %v6422_v15, %v13782_v35 }
 0x25e   : > { %12174 = vmatprep.subr.mxu0 %v13641_v36  ;;  %12200 = vmatmul.mubr.f32.vlgmr.msra.gmra.mxu1 %v13750_v46  ;;  %v1420_v10 = vpop.f32.mrf.mxu0  ;;  %v1839_v28 = vpop.f32.mrf.mxu1 }
 0x25f   : > { %12209 = vmatprep.subr.mxu1 %v13708_v7  ;;  %12175 = vmatpush3.msra.mxu0 %v13641_v36  ;;  %v1512_v36 = vadd.f32 %v1511_v59, %v1420_v10 }
 0x260   : > { %12178 = vmatprep.mubr.f32.mxu0 %v13692_v18  ;;  %12210 = vmatpush3.msra.mxu1 %v13708_v7  ;;  %v5999_v18 = vsub.f32 %v13761_v52, %v5998_v56 }
 0x261   : > { %12213 = vmatprep.mubr.f32.mxu1 %v5988_v5  ;;  %12176 = vmatprep.subr.mxu0 %v13655_v37  ;;  %v11830_v6 = vpop.f32.mrf.mxu0 }
 0x262   : > { %12211 = vmatprep.subr.mxu1 %v13713_v60  ;;  %12177 = vmatpush3.msra.mxu0 %v13655_v37  ;;  %v1601_v27 = vadd.f32 %v11830_v6, %v1518_v0  ;;  %v13780_v43 = vpop.f32.mrf.mxu1  ;;  %v6000_v62 = vand.u32 4294901760, %v5999_v18 }
 0x263   : > { %12212 = vmatpush3.msra.mxu1 %v13713_v60  ;;  %12179 = vmatmul.mubr.f32.vlgmr.msra.gmra.mxu0 %v13727_v23  ;;  %v1593_v63 = vpop.f32.mrf.mxu0 }
 0x264   : > { %12188 = vmatprep.subr.mxu0 %v13708_v7  ;;  %12214 = vmatmul.mubr.f32.vlgmr.msra.gmra.mxu1 %v5998_v56  ;;  %v1594_v21 = vadd.f32 %v1593_v63, %v1512_v36  ;;  %v13790_v37 = vpop.f32.mrf.mxu1  ;;  %v1684_v50 = vadd.f32 %v11837_v3, %v1601_v27 }
 0x265   : > { %12223 = vmatprep.subr.mxu1 %v13708_v7  ;;  %12189 = vmatpush3.msra.mxu0 %v13708_v7 }
 0x266   : > { %12192 = vmatprep.mubr.f32.mxu0 %v5990_v9  ;;  %12224 = vmatpush3.msra.mxu1 %v13708_v7  ;;  %v1676_v34 = vadd.f32 %v1675_v31, %v1594_v21  ;;  %v6493_v7 = vand.u32 4294901760, %v13794_v53 }
 0x267   : > { %12227 = vmatprep.mubr.f32.mxu1 %v13741_v40  ;;  %12190 = vmatprep.subr.mxu0 %v13713_v60 }
 0x268   : > { %12225 = vmatprep.subr.mxu1 %v13713_v60  ;;  %12191 = vmatpush3.msra.mxu0 %v13713_v60  ;;  %v11844_v55 = vpop.f32.mrf.mxu0  ;;  %v6494_v20 = vsub.f32 %v13794_v53, %v6493_v7 }
 0x269   : > { %12226 = vmatpush3.msra.mxu1 %v13713_v60  ;;  %12193 = vmatmul.mubr.f32.vlgmr.msra.gmra.mxu0 %v6000_v62  ;;  %v1767_v42 = vadd.f32 %v11844_v55, %v1684_v50  ;;  %v13801_v58 = vpop.f32.mrf.mxu1 }
 0x26a   : > { %12202 = vmatprep.subr.mxu0 %v13718_v29  ;;  %12228 = vmatmul.mubr.f32.vlgmr.msra.gmra.mxu1 %v13750_v46  ;;  %v1760_v1 = vpop.f32.mrf.mxu0  ;;  %v6495_v48 = vand.u32 4294901760, %v6494_v20 }
 0x26b   : > { %12203 = vmatpush3.msra.mxu0 %v13718_v29  ;;  %12206 = vmatprep.mubr.f32.mxu0 %v13754_v30  ;;  %v1846_v39 = vadd.f32 %v11851_v11, %v1767_v42  ;;  %v1761_v51 = vadd.f32 %v1760_v1, %v1676_v34  ;;  %v2183_v60 = vpop.f32.mrf.mxu1  ;;  %v250_v29 = vld [vmem:[%s14490_s4 + $0x8] sm:$0xff] }
 0x26c   : > { %12204 = vmatprep.subr.mxu0 %v13721_v32  ;;  %12237 = vmatprep.subr.mxu1 %v12684_v2  ;;  %v6884_v38 = vsel %vm1340_vm1, %v250_v29, 0 }
 0x26d   : > { %12205 = vmatpush3.msra.mxu0 %v13721_v32  ;;  %v13811_v17 = vand.u32 4294901760, %v1846_v39  ;;  %v1840_v13 = vadd.f32 %v1839_v28, %v1761_v51  ;;  %12241 = vmatprep.mubr.msk.f32.mxu1 %vm12695_vm2, %v12684_v2  ;;  %v13837_v33 = vand.u32 4294901760, %v6884_v38 }
 0x26e   : > { %12207 = vmatmul.mubr.f32.vlgmr.msra.gmra.mxu0 %v13761_v52  ;;  %12216 = vmatprep.subr.mxu0 %v13725_v22 }
 0x26f   : > { %12217 = vmatpush3.msra.mxu0 %v13725_v22  ;;  %12220 = vmatprep.mubr.f32.mxu0 %v13741_v40  ;;  %v6531_v32 = vsub.f32 %v1846_v39, %v13811_v17  ;;  %v13826_v12 = vand.u32 4294901760, %v1840_v13  ;;  %v11858_v4 = vpop.f32.mrf.mxu0  ;;  %v13849_v30 = vsub.f32 %v6884_v38, %v13837_v33 }
 0x270   : > { %12218 = vmatprep.subr.mxu0 %v13732_v8  ;;  %v11893_v23 = vpop.f32.mrf.mxu1 }
 0x271   : > { %12219 = vmatpush3.msra.mxu0 %v13732_v8  ;;  %v6532_v25 = vand.u32 4294901760, %v6531_v32  ;;  %v6538_v41 = vsub.f32 %v1840_v13, %v13826_v12  ;;  %v1928_v22 = vpop.f32.mrf.mxu0  ;;  %v2026_v8 = vadd.f32 %v13780_v43, %v11858_v4  ;;  %v6955_v16 = vand.u32 4294901760, %v13849_v30  ;;  %v251_v43 = vld [vmem:[%s14490_s4 + $0x10] sm:$0xff] }
 0x272   : > { %12221 = vmatmul.mubr.f32.vlgmr.msra.gmra.mxu0 %v13750_v46  ;;  %12230 = vmatprep.subr.mxu0 %v12684_v2  ;;  %v2347_v24 = vpop.f32.mrf.mxu1  ;;  %v2020_v47 = vadd.f32 %v13790_v37, %v1928_v22  ;;  %v7346_v50 = vsel %vm1340_vm1, %v251_v43, 0 }
 0x273   : > { %12231 = vmatpush3.msra.mxu0 %v13811_v17  ;;  %12234 = vmatprep.mubr.msk.f32.mxu0 %vm12695_vm2, %v12684_v2  ;;  %v6533_v19 = vsub.f32 %v6531_v32, %v6532_v25  ;;  %v6539_v40 = vand.u32 4294901760, %v6538_v41  ;;  %v6956_v15 = vsub.f32 %v13849_v30, %v6955_v16  ;;  %v13904_v1 = vand.u32 4294901760, %v7346_v50 }
 0x274   : > { %12232 = vmatprep.subr.mxu0 %v12684_v2 }
 0x275   : > { %12233 = vmatpush3.msra.mxu0 %v13826_v12  ;;  %v6534_v61 = vand.u32 4294901760, %v6533_v19  ;;  %v6540_v45 = vsub.f32 %v6538_v41, %v6539_v40  ;;  %v6957_v18 = vand.u32 4294901760, %v6956_v15  ;;  %v13916_v20 = vsub.f32 %v7346_v50, %v13904_v1 }
 0x276   : > { %v11872_v44 = vpop.f32.mrf.mxu0  ;;  %12244 = vmatprep.subr.mxu0 %v12684_v2  ;;  %12235 = vmatmul.mubr.f32.vlgmr.msra.gmra.mxu0 %v6495_v48 }
 0x277   : > { %v2109_v59 = vadd.f32 %v11872_v44, %v2026_v8  ;;  %v13844_v46 = vpop.f32.mrf.mxu1  ;;  %12245 = vmatpush3.msra.mxu0 %v6531_v32  ;;  %12248 = vmatprep.mubr.msk.f32.mxu0 %vm12695_vm2, %v12684_v2  ;;  %v6541_v14 = vand.u32 4294901760, %v6540_v45  ;;  %v7417_v38 = vand.u32 4294901760, %v13916_v20 }
 0x278   : > { %v2101_v3 = vpop.f32.mrf.mxu0  ;;  %12246 = vmatprep.subr.mxu0 %v12684_v2  ;;  %12238 = vmatpush3.msra.mxu1 %v6534_v61 }
 0x279   : > { %v2102_v31 = vadd.f32 %v2101_v3, %v2020_v47  ;;  %12247 = vmatpush3.msra.mxu0 %v6538_v41  ;;  %12239 = vmatprep.subr.mxu1 %v12684_v2  ;;  %v13853_v52 = vpop.f32.mrf.mxu1  ;;  %v2192_v5 = vadd.f32 %v13801_v58, %v2109_v59  ;;  %v7418_v19 = vsub.f32 %v13916_v20, %v7417_v38 }
 0x27a   : > { %12258 = vmatprep.subr.mxu0 %v12684_v2  ;;  %12249 = vmatmul.mubr.f32.vlgmr.msra.gmra.mxu0 %v13794_v53 }
 0x27b   : > { %12259 = vmatpush3.msra.mxu0 %v6532_v25  ;;  %12240 = vmatpush3.msra.mxu1 %v6541_v14  ;;  %v2184_v11 = vadd.f32 %v2183_v60, %v2102_v31  ;;  %v7419_v14 = vand.u32 4294901760, %v7418_v19 }
 0x27c   : > { %12260 = vmatprep.subr.mxu0 %v12684_v2  ;;  %12242 = vmatmul.mubr.f32.vlgmr.msra.gmra.mxu1 %v13782_v35 }
 0x27d   : > { %v11886_v49 = vpop.f32.mrf.mxu0  ;;  %12261 = vmatpush3.msra.mxu0 %v6539_v40  ;;  %12251 = vmatprep.subr.mxu1 %v12684_v2  ;;  %v252_v40 = vld [vmem:[%s14490_s4 + $0x18] sm:$0xff] }
 0x27e   : > { %v2275_v10 = vadd.f32 %v11886_v49, %v2192_v5  ;;  %v13862_v28 = vpop.f32.mrf.mxu1  ;;  %12262 = vmatprep.mubr.msk.f32.mxu0 %vm12695_vm2, %v12684_v2  ;;  %12272 = vmatprep.subr.mxu0 %v12684_v2  ;;  %v7808_v59 = vsel %vm1340_vm1, %v252_v40, 0 }
 0x27f   : > { %v2268_v56 = vpop.f32.mrf.mxu0  ;;  %12252 = vmatpush3.msra.mxu1 %v13811_v17  ;;  %12263 = vmatmul.mubr.f32.vlgmr.msra.gmra.mxu0 %v13782_v35  ;;  %v13962_v5 = vand.u32 4294901760, %v7808_v59 }
 0x280   : > { %v2354_v54 = vadd.f32 %v11893_v23, %v2275_v10  ;;  %v2269_v0 = vadd.f32 %v2268_v56, %v2184_v11  ;;  %12253 = vmatprep.subr.mxu1 %v12684_v2  ;;  %12255 = vmatprep.mubr.msk.f32.mxu1 %vm12695_vm2, %v12684_v2  ;;  %v13875_v6 = vpop.f32.mrf.mxu1 }
 0x281   : > { %12254 = vmatpush3.msra.mxu1 %v13826_v12  ;;  %12276 = vmatprep.mubr.msk.f32.mxu0 %vm12695_vm2, %v12684_v2  ;;  %v13971_v15 = vsub.f32 %v7808_v59, %v13962_v5 }
 0x282   : > { %v13880_v36 = vand.u32 4294901760, %v2354_v54  ;;  %v2348_v27 = vadd.f32 %v2347_v24, %v2269_v0  ;;  %12256 = vmatmul.mubr.f32.vlgmr.msra.gmra.mxu1 %v6493_v7  ;;  %12265 = vmatprep.subr.mxu1 %v12684_v2 }
 0x283   : > { %12266 = vmatpush3.msra.mxu1 %v13811_v17  ;;  %12269 = vmatprep.mubr.msk.f32.mxu1 %vm12695_vm2, %v12684_v2 }
 0x284   : > { %v6993_v63 = vsub.f32 %v2354_v54, %v13880_v36  ;;  %v13892_v9 = vand.u32 4294901760, %v2348_v27  ;;  %v11900_v21 = vpop.f32.mrf.mxu0  ;;  %12273 = vmatpush3.msra.mxu0 %v13880_v36  ;;  %12267 = vmatprep.subr.mxu1 %v12684_v2 }
 0x285   : > { %v11935_v37 = vpop.f32.mrf.mxu1  ;;  %12274 = vmatprep.subr.mxu0 %v12684_v2  ;;  %12268 = vmatpush3.msra.mxu1 %v13826_v12  ;;  %v2534_v7 = vadd.f32 %v13844_v46, %v11900_v21 }
 0x286   : > { %v6994_v53 = vand.u32 4294901760, %v6993_v63  ;;  %v7000_v62 = vsub.f32 %v2348_v27, %v13892_v9  ;;  %12275 = vmatpush3.msra.mxu0 %v13892_v9  ;;  %12270 = vmatmul.mubr.f32.vlgmr.msra.gmra.mxu1 %v13782_v35  ;;  %v2436_v34 = vpop.f32.mrf.mxu0 }
 0x287   : > { %12286 = vmatprep.subr.mxu0 %v12684_v2  ;;  %12277 = vmatmul.mubr.f32.vlgmr.msra.gmra.mxu0 %v6957_v18  ;;  %v2855_v42 = vpop.f32.mrf.mxu1  ;;  %v2528_v60 = vadd.f32 %v13853_v52, %v2436_v34 }
 0x288   : > { %v7001_v55 = vand.u32 4294901760, %v7000_v62  ;;  %12287 = vmatpush3.msra.mxu0 %v6993_v63  ;;  %12279 = vmatprep.subr.mxu1 %v12684_v2  ;;  %v6995_v58 = vsub.f32 %v6993_v63, %v6994_v53 }
 0x289   : > { %12288 = vmatprep.subr.mxu0 %v12684_v2  ;;  %12290 = vmatprep.mubr.msk.f32.mxu0 %vm12695_vm2, %v12684_v2 }
 0x28a   : > { %12289 = vmatpush3.msra.mxu0 %v7000_v62  ;;  %v6996_v35 = vand.u32 4294901760, %v6995_v58  ;;  %v7002_v39 = vsub.f32 %v7000_v62, %v7001_v55  ;;  %12283 = vmatprep.mubr.msk.f32.mxu1 %vm12695_vm2, %v12684_v2  ;;  %v253_v58 = vld [vmem:[%s14490_s4 + $0x20] sm:$0xff] }
 0x28b   : > { %v11914_v51 = vpop.f32.mrf.mxu0  ;;  %12300 = vmatprep.subr.mxu0 %v12684_v2  ;;  %12291 = vmatmul.mubr.f32.vlgmr.msra.gmra.mxu0 %v13849_v30 }
 0x28c   : > { %v2617_v17 = vadd.f32 %v11914_v51, %v2534_v7  ;;  %v11949_v13 = vpop.f32.mrf.mxu1  ;;  %12280 = vmatpush3.msra.mxu1 %v6996_v35  ;;  %12301 = vmatpush3.msra.mxu0 %v6994_v53  ;;  %v7003_v29 = vand.u32 4294901760, %v7002_v39 }
 0x28d   : > { %v2609_v32 = vpop.f32.mrf.mxu0  ;;  %12281 = vmatprep.subr.mxu1 %v12684_v2  ;;  %12302 = vmatprep.subr.mxu0 %v12684_v2 }
 0x28e   : > { %v2610_v12 = vadd.f32 %v2609_v32, %v2528_v60  ;;  %12282 = vmatpush3.msra.mxu1 %v7003_v29  ;;  %12303 = vmatpush3.msra.mxu0 %v7001_v55  ;;  %v3035_v4 = vpop.f32.mrf.mxu1  ;;  %v2700_v23 = vadd.f32 %v13862_v28, %v2617_v17  ;;  %v8270_v17 = vsel %vm1340_vm1, %v253_v58, 0 }
 0x28f   : > { %12284 = vmatmul.mubr.f32.vlgmr.msra.gmra.mxu1 %v13837_v33  ;;  %12293 = vmatprep.subr.mxu1 %v12684_v2 }
 0x290   : > { %12304 = vmatprep.mubr.msk.f32.mxu0 %vm12695_vm2, %v12684_v2  ;;  %12314 = vmatprep.subr.mxu0 %v12684_v2  ;;  %v2692_v25 = vadd.f32 %v13875_v6, %v2610_v12 }
 0x291   : > { %12294 = vmatpush3.msra.mxu1 %v13880_v36  ;;  %12305 = vmatmul.mubr.f32.vlgmr.msra.gmra.mxu0 %v13837_v33 }
 0x292   : > { %v11928_v41 = vpop.f32.mrf.mxu0  ;;  %12295 = vmatprep.subr.mxu1 %v12684_v2  ;;  %12297 = vmatprep.mubr.msk.f32.mxu1 %vm12695_vm2, %v12684_v2 }
 0x293   : > { %v2783_v22 = vadd.f32 %v11928_v41, %v2700_v23  ;;  %v11963_v48 = vpop.f32.mrf.mxu1  ;;  %12296 = vmatpush3.msra.mxu1 %v13892_v9  ;;  %12318 = vmatprep.mubr.msk.f32.mxu0 %vm12695_vm2, %v12684_v2  ;;  %v14017_v23 = vand.u32 4294901760, %v8270_v17 }
 0x294   : > { %v2776_v24 = vpop.f32.mrf.mxu0  ;;  %12298 = vmatmul.mubr.f32.vlgmr.msra.gmra.mxu1 %v6955_v16  ;;  %12307 = vmatprep.subr.mxu1 %v12684_v2 }
 0x295   : > { %v2862_v8 = vadd.f32 %v11935_v37, %v2783_v22  ;;  %v2777_v61 = vadd.f32 %v2776_v24, %v2692_v25  ;;  %v3199_v45 = vpop.f32.mrf.mxu1  ;;  %12308 = vmatpush3.msra.mxu1 %v13880_v36  ;;  %12311 = vmatprep.mubr.msk.f32.mxu1 %vm12695_vm2, %v12684_v2  ;;  %v7879_v37 = vand.u32 4294901760, %v13971_v15  ;;  %v14029_v40 = vsub.f32 %v8270_v17, %v14017_v23 }
 0x296   : > { %12309 = vmatprep.subr.mxu1 %v12684_v2 }
 0x297   : > { %v13949_v44 = vand.u32 4294901760, %v2862_v8  ;;  %v2856_v47 = vadd.f32 %v2855_v42, %v2777_v61  ;;  %12310 = vmatpush3.msra.mxu1 %v13892_v9  ;;  %v7880_v42 = vsub.f32 %v13971_v15, %v7879_v37 }
 0x298   : > { %v11942_v46 = vpop.f32.mrf.mxu0  ;;  %12312 = vmatmul.mubr.f32.vlgmr.msra.gmra.mxu1 %v13837_v33  ;;  %12321 = vmatprep.subr.mxu1 %v12684_v2 }
 0x299   : > { %v7455_v30 = vsub.f32 %v2862_v8, %v13949_v44  ;;  %v13956_v3 = vand.u32 4294901760, %v2856_v47  ;;  %v11977_v31 = vpop.f32.mrf.mxu1  ;;  %12315 = vmatpush3.msra.mxu0 %v13949_v44  ;;  %12325 = vmatprep.mubr.msk.f32.mxu1 %vm12695_vm2, %v12684_v2  ;;  %v3042_v10 = vadd.f32 %v11949_v13, %v11942_v46  ;;  %v7881_v29 = vand.u32 4294901760, %v7880_v42 }
 0x29a   : > { %v2944_v52 = vpop.f32.mrf.mxu0  ;;  %12316 = vmatprep.subr.mxu0 %v12684_v2 }
 0x29b   : > { %v7456_v16 = vand.u32 4294901760, %v7455_v30  ;;  %v7462_v33 = vsub.f32 %v2856_v47, %v13956_v3  ;;  %v3363_v11 = vpop.f32.mrf.mxu1  ;;  %12317 = vmatpush3.msra.mxu0 %v13956_v3  ;;  %v3036_v54 = vadd.f32 %v3035_v4, %v2944_v52 }
 0x29c   : > { %12328 = vmatprep.subr.mxu0 %v12684_v2  ;;  %12319 = vmatmul.mubr.f32.vlgmr.msra.gmra.mxu0 %v7419_v14 }
 0x29d   : > { %v7463_v49 = vand.u32 4294901760, %v7462_v33  ;;  %12329 = vmatpush3.msra.mxu0 %v7455_v30  ;;  %12332 = vmatprep.mubr.msk.f32.mxu0 %vm12695_vm2, %v12684_v2  ;;  %v7457_v28 = vsub.f32 %v7455_v30, %v7456_v16 }
 0x29e   : > { %v11956_v56 = vpop.f32.mrf.mxu0  ;;  %12330 = vmatprep.subr.mxu0 %v12684_v2 }
 0x29f   : > { %v3125_v0 = vadd.f32 %v11956_v56, %v3042_v10  ;;  %v13973_v6 = vpop.f32.mrf.mxu1  ;;  %12331 = vmatpush3.msra.mxu0 %v7462_v33  ;;  %v7458_v36 = vand.u32 4294901760, %v7457_v28  ;;  %v7464_v27 = vsub.f32 %v7462_v33, %v7463_v49  ;;  %v254_v10 = vld [vmem:[%s14490_s4 + $0x28] sm:$0xff] }
 0x2a0   : > { %v3117_v43 = vpop.f32.mrf.mxu0  ;;  %12342 = vmatprep.subr.mxu0 %v12684_v2  ;;  %12333 = vmatmul.mubr.f32.vlgmr.msra.gmra.mxu0 %v13916_v20 }
 0x2a1   : > { %v3118_v18 = vadd.f32 %v3117_v43, %v3036_v54  ;;  %v13977_v63 = vpop.f32.mrf.mxu1  ;;  %v3208_v9 = vadd.f32 %v11963_v48, %v3125_v0  ;;  %12322 = vmatpush3.msra.mxu1 %v7458_v36  ;;  %12343 = vmatpush3.msra.mxu0 %v7456_v16  ;;  %v7465_v21 = vand.u32 4294901760, %v7464_v27  ;;  %v8732_v36 = vsel %vm1340_vm1, %v254_v10, 0 }
 0x2a2   : > { %12323 = vmatprep.subr.mxu1 %v12684_v2  ;;  %12344 = vmatprep.subr.mxu0 %v12684_v2 }
 0x2a3   : > { %v3200_v50 = vadd.f32 %v3199_v45, %v3118_v18  ;;  %12324 = vmatpush3.msra.mxu1 %v7465_v21  ;;  %12345 = vmatpush3.msra.mxu0 %v7463_v49  ;;  %v14078_v21 = vand.u32 4294901760, %v8732_v36 }
 0x2a4   : > { %v11970_v53 = vpop.f32.mrf.mxu0  ;;  %12326 = vmatmul.mubr.f32.vlgmr.msra.gmra.mxu1 %v13904_v1  ;;  %12335 = vmatprep.subr.mxu1 %v12684_v2 }
 0x2a5   : > { %v3291_v62 = vadd.f32 %v11970_v53, %v3208_v9  ;;  %v12005_v34 = vpop.f32.mrf.mxu1  ;;  %12346 = vmatprep.mubr.msk.f32.mxu0 %vm12695_vm2, %v12684_v2  ;;  %12356 = vmatprep.subr.mxu0 %v12684_v2  ;;  %v14090_v58 = vsub.f32 %v8732_v36, %v14078_v21 }
 0x2a6   : > { %v3284_v55 = vpop.f32.mrf.mxu0  ;;  %12336 = vmatpush3.msra.mxu1 %v13949_v44  ;;  %12347 = vmatmul.mubr.f32.vlgmr.msra.gmra.mxu0 %v13904_v1 }
 0x2a7   : > { %v3370_v7 = vadd.f32 %v11977_v31, %v3291_v62  ;;  %v3285_v35 = vadd.f32 %v3284_v55, %v3200_v50  ;;  %v3707_v39 = vpop.f32.mrf.mxu1  ;;  %12337 = vmatprep.subr.mxu1 %v12684_v2  ;;  %12339 = vmatprep.mubr.msk.f32.mxu1 %vm12695_vm2, %v12684_v2 }
 0x2a8   : > { %12338 = vmatpush3.msra.mxu1 %v13956_v3  ;;  %12360 = vmatprep.mubr.msk.f32.mxu0 %vm12695_vm2, %v12684_v2 }
 0x2a9   : > { %v14001_v51 = vand.u32 4294901760, %v3370_v7  ;;  %v3364_v60 = vadd.f32 %v3363_v11, %v3285_v35  ;;  %12340 = vmatmul.mubr.f32.vlgmr.msra.gmra.mxu1 %v7417_v38  ;;  %12349 = vmatprep.subr.mxu1 %v12684_v2 }
 0x2aa   : > { %v11984_v13 = vpop.f32.mrf.mxu0  ;;  %12350 = vmatpush3.msra.mxu1 %v13949_v44  ;;  %12353 = vmatprep.mubr.msk.f32.mxu1 %vm12695_vm2, %v12684_v2 }
 0x2ab   : > { %v7917_v32 = vsub.f32 %v3370_v7, %v14001_v51  ;;  %v14011_v12 = vand.u32 4294901760, %v3364_v60  ;;  %v12019_v4 = vpop.f32.mrf.mxu1  ;;  %12357 = vmatpush3.msra.mxu0 %v14001_v51  ;;  %12351 = vmatprep.subr.mxu1 %v12684_v2  ;;  %v3550_v48 = vadd.f32 %v13973_v6, %v11984_v13 }
 0x2ac   : > { %v3452_v20 = vpop.f32.mrf.mxu0  ;;  %12358 = vmatprep.subr.mxu0 %v12684_v2  ;;  %12352 = vmatpush3.msra.mxu1 %v13956_v3  ;;  %v8341_v3 = vand.u32 4294901760, %v14029_v40 }
 0x2ad   : > { %v7918_v38 = vand.u32 4294901760, %v7917_v32  ;;  %v7924_v25 = vsub.f32 %v3364_v60, %v14011_v12  ;;  %v3871_v41 = vpop.f32.mrf.mxu1  ;;  %12359 = vmatpush3.msra.mxu0 %v14011_v12  ;;  %12354 = vmatmul.mubr.f32.vlgmr.msra.gmra.mxu1 %v13904_v1  ;;  %v3544_v1 = vadd.f32 %v13977_v63, %v3452_v20 }
 0x2ae   : > { %12370 = vmatprep.subr.mxu0 %v12684_v2  ;;  %12361 = vmatmul.mubr.f32.vlgmr.msra.gmra.mxu0 %v7881_v29  ;;  %v8342_v49 = vsub.f32 %v14029_v40, %v8341_v3 }
 0x2af   : > { %v7925_v22 = vand.u32 4294901760, %v7924_v25  ;;  %12371 = vmatpush3.msra.mxu0 %v7917_v32  ;;  %12363 = vmatprep.subr.mxu1 %v12684_v2  ;;  %v7919_v24 = vsub.f32 %v7917_v32, %v7918_v38 }
 0x2b0   : > { %v11998_v19 = vpop.f32.mrf.mxu0  ;;  %12372 = vmatprep.subr.mxu0 %v12684_v2  ;;  %12374 = vmatprep.mubr.msk.f32.mxu0 %vm12695_vm2, %v12684_v2  ;;  %v8343_v43 = vand.u32 4294901760, %v8342_v49 }
 0x2b1   : > { %v3633_v8 = vadd.f32 %v11998_v19, %v3550_v48  ;;  %v14032_v61 = vpop.f32.mrf.mxu1  ;;  %12373 = vmatpush3.msra.mxu0 %v7924_v25  ;;  %v7920_v45 = vand.u32 4294901760, %v7919_v24  ;;  %v7926_v44 = vsub.f32 %v7924_v25, %v7925_v22  ;;  %12367 = vmatprep.mubr.msk.f32.mxu1 %vm12695_vm2, %v12684_v2  ;;  %v255_v48 = vld [vmem:[%s14490_s4 + $0x30] sm:$0xff] }
 0x2b2   : > { %v3625_v47 = vpop.f32.mrf.mxu0  ;;  %12384 = vmatprep.subr.mxu0 %v12684_v2  ;;  %12375 = vmatmul.mubr.f32.vlgmr.msra.gmra.mxu0 %v13971_v15 }
 0x2b3   : > { %v3626_v59 = vadd.f32 %v3625_v47, %v3544_v1  ;;  %v14038_v46 = vpop.f32.mrf.mxu1  ;;  %v3716_v14 = vadd.f32 %v12005_v34, %v3633_v8  ;;  %12364 = vmatpush3.msra.mxu1 %v7920_v45  ;;  %12385 = vmatpush3.msra.mxu0 %v7918_v38  ;;  %v7927_v30 = vand.u32 4294901760, %v7926_v44  ;;  %v9194_v45 = vsel %vm1340_vm1, %v255_v48, 0 }
 0x2b4   : > { %12365 = vmatprep.subr.mxu1 %v12684_v2  ;;  %12386 = vmatprep.subr.mxu0 %v12684_v2 }
 0x2b5   : > { %v3708_v31 = vadd.f32 %v3707_v39, %v3626_v59  ;;  %12366 = vmatpush3.msra.mxu1 %v7927_v30  ;;  %12387 = vmatpush3.msra.mxu0 %v7925_v22 }
 0x2b6   : > { %v12012_v52 = vpop.f32.mrf.mxu0  ;;  %12368 = vmatmul.mubr.f32.vlgmr.msra.gmra.mxu1 %v13962_v5  ;;  %12377 = vmatprep.subr.mxu1 %v12684_v2 }
 0x2b7   : > { %v3799_v16 = vadd.f32 %v12012_v52, %v3716_v14  ;;  %v12047_v33 = vpop.f32.mrf.mxu1  ;;  %12388 = vmatprep.mubr.msk.f32.mxu0 %vm12695_vm2, %v12684_v2  ;;  %12398 = vmatprep.subr.mxu0 %v12684_v2  ;;  %v14139_v14 = vand.u32 4294901760, %v9194_v45 }
 0x2b8   : > { %v3792_v11 = vpop.f32.mrf.mxu0  ;;  %12378 = vmatpush3.msra.mxu1 %v14001_v51  ;;  %12389 = vmatmul.mubr.f32.vlgmr.msra.gmra.mxu0 %v13962_v5 }
 0x2b9   : > { %v3878_v28 = vadd.f32 %v12019_v4, %v3799_v16  ;;  %v3793_v56 = vadd.f32 %v3792_v11, %v3708_v31  ;;  %v4215_v54 = vpop.f32.mrf.mxu1  ;;  %12379 = vmatprep.subr.mxu1 %v12684_v2  ;;  %12381 = vmatprep.mubr.msk.f32.mxu1 %vm12695_vm2, %v12684_v2  ;;  %v14151_v49 = vsub.f32 %v9194_v45, %v14139_v14 }
 0x2ba   : > { %12380 = vmatpush3.msra.mxu1 %v14011_v12  ;;  %12402 = vmatprep.mubr.msk.f32.mxu0 %vm12695_vm2, %v12684_v2 }
 0x2bb   : > { %v14062_v0 = vand.u32 4294901760, %v3878_v28  ;;  %v3872_v6 = vadd.f32 %v3871_v41, %v3793_v56  ;;  %12382 = vmatmul.mubr.f32.vlgmr.msra.gmra.mxu1 %v7879_v37  ;;  %12391 = vmatprep.subr.mxu1 %v12684_v2 }
 0x2bc   : > { %v12026_v27 = vpop.f32.mrf.mxu0  ;;  %12392 = vmatpush3.msra.mxu1 %v14001_v51  ;;  %12395 = vmatprep.mubr.msk.f32.mxu1 %vm12695_vm2, %v12684_v2 }
 0x2bd   : > { %v8379_v18 = vsub.f32 %v3878_v28, %v14062_v0  ;;  %v14072_v63 = vand.u32 4294901760, %v3872_v6  ;;  %v12061_v9 = vpop.f32.mrf.mxu1  ;;  %12399 = vmatpush3.msra.mxu0 %v14062_v0  ;;  %12393 = vmatprep.subr.mxu1 %v12684_v2  ;;  %v4058_v34 = vadd.f32 %v14032_v61, %v12026_v27 }
 0x2be   : > { %v3960_v15 = vpop.f32.mrf.mxu0  ;;  %12400 = vmatprep.subr.mxu0 %v12684_v2  ;;  %12394 = vmatpush3.msra.mxu1 %v14011_v12  ;;  %v8803_v12 = vand.u32 4294901760, %v14090_v58 }
 0x2bf   : > { %v8380_v37 = vand.u32 4294901760, %v8379_v18  ;;  %v8386_v50 = vsub.f32 %v3872_v6, %v14072_v63  ;;  %v4379_v53 = vpop.f32.mrf.mxu1  ;;  %12401 = vmatpush3.msra.mxu0 %v14072_v63  ;;  %12396 = vmatmul.mubr.f32.vlgmr.msra.gmra.mxu1 %v13962_v5  ;;  %v4052_v5 = vadd.f32 %v14038_v46, %v3960_v15  ;;  %v256_v15 = vld [vmem:[%s14490_s4 + $0x38] sm:$0xff] }
 0x2c0   : > { %12412 = vmatprep.subr.mxu0 %v12684_v2  ;;  %12403 = vmatmul.mubr.f32.vlgmr.msra.gmra.mxu0 %v8343_v43  ;;  %v8804_v22 = vsub.f32 %v14090_v58, %v8803_v12  ;;  %v9265_v43 = vand.u32 4294901760, %v14151_v49 }
 0x2c1   : > { %v8387_v62 = vand.u32 4294901760, %v8386_v50  ;;  %12413 = vmatpush3.msra.mxu0 %v8379_v18  ;;  %12405 = vmatprep.subr.mxu1 %v12684_v2  ;;  %v8381_v55 = vsub.f32 %v8379_v18, %v8380_v37 }
 0x2c2   : > { %v12040_v42 = vpop.f32.mrf.mxu0  ;;  %12414 = vmatprep.subr.mxu0 %v12684_v2  ;;  %12416 = vmatprep.mubr.msk.f32.mxu0 %vm12695_vm2, %v12684_v2  ;;  %v8805_v47 = vand.u32 4294901760, %v8804_v22 }
 0x2c3   : > { %v4141_v7 = vadd.f32 %v12040_v42, %v4058_v34  ;;  %v14093_v35 = vpop.f32.mrf.mxu1  ;;  %12415 = vmatpush3.msra.mxu0 %v8386_v50  ;;  %v8382_v39 = vand.u32 4294901760, %v8381_v55  ;;  %v8388_v51 = vsub.f32 %v8386_v50, %v8387_v62  ;;  %12409 = vmatprep.mubr.msk.f32.mxu1 %vm12695_vm2, %v12684_v2  ;;  %v9656_v42 = vsel %vm1340_vm1, %v256_v15, 0 }
 0x2c4   : > { %v4133_v60 = vpop.f32.mrf.mxu0  ;;  %12426 = vmatprep.subr.mxu0 %v12684_v2  ;;  %12417 = vmatmul.mubr.f32.vlgmr.msra.gmra.mxu0 %v14029_v40 }
 0x2c5   : > { %v4134_v17 = vadd.f32 %v4133_v60, %v4052_v5  ;;  %v14099_v13 = vpop.f32.mrf.mxu1  ;;  %v4224_v29 = vadd.f32 %v12047_v33, %v4141_v7  ;;  %12406 = vmatpush3.msra.mxu1 %v8382_v39  ;;  %12427 = vmatpush3.msra.mxu0 %v8380_v37  ;;  %v8389_v32 = vand.u32 4294901760, %v8388_v51  ;;  %v14189_v51 = vand.u32 4294901760, %v9656_v42 }
 0x2c6   : > { %12407 = vmatprep.subr.mxu1 %v12684_v2  ;;  %12428 = vmatprep.subr.mxu0 %v12684_v2 }
 0x2c7   : > { %v4216_v4 = vadd.f32 %v4215_v54, %v4134_v17  ;;  %12408 = vmatpush3.msra.mxu1 %v8389_v32  ;;  %12429 = vmatpush3.msra.mxu0 %v8387_v62 }
 0x2c8   : > { %v12054_v20 = vpop.f32.mrf.mxu0  ;;  %12410 = vmatmul.mubr.f32.vlgmr.msra.gmra.mxu1 %v14017_v23  ;;  %12419 = vmatprep.subr.mxu1 %v12684_v2 }
 0x2c9   : > { %v4307_v38 = vadd.f32 %v12054_v20, %v4224_v29  ;;  %v12089_v25 = vpop.f32.mrf.mxu1  ;;  %12430 = vmatprep.mubr.msk.f32.mxu0 %vm12695_vm2, %v12684_v2  ;;  %12440 = vmatprep.subr.mxu0 %v12684_v2 }
 0x2ca   : > { %v4300_v41 = vpop.f32.mrf.mxu0  ;;  %12420 = vmatpush3.msra.mxu1 %v14062_v0  ;;  %12431 = vmatmul.mubr.f32.vlgmr.msra.gmra.mxu0 %v14017_v23 }
 0x2cb   : > { %v4386_v24 = vadd.f32 %v12061_v9, %v4307_v38  ;;  %v4301_v19 = vadd.f32 %v4300_v41, %v4216_v4  ;;  %12421 = vmatprep.subr.mxu1 %v12684_v2  ;;  %12423 = vmatprep.mubr.msk.f32.mxu1 %vm12695_vm2, %v12684_v2  ;;  %v4723_v61 = vpop.f32.mrf.mxu1  ;;  %v14203_v4 = vsub.f32 %v9656_v42, %v14189_v51 }
 0x2cc   : > { %12422 = vmatpush3.msra.mxu1 %v14072_v63  ;;  %12444 = vmatprep.mubr.msk.f32.mxu0 %vm12695_vm2, %v12684_v2 }
 0x2cd   : > { %v14123_v1 = vand.u32 4294901760, %v4386_v24  ;;  %v4380_v8 = vadd.f32 %v4379_v53, %v4301_v19  ;;  %12424 = vmatmul.mubr.f32.vlgmr.msra.gmra.mxu1 %v8341_v3  ;;  %12433 = vmatprep.subr.mxu1 %v12684_v2  ;;  %v9266_v53 = vsub.f32 %v14151_v49, %v9265_v43 }
 0x2ce   : > { %v12068_v44 = vpop.f32.mrf.mxu0  ;;  %12434 = vmatpush3.msra.mxu1 %v14062_v0  ;;  %12437 = vmatprep.mubr.msk.f32.mxu1 %vm12695_vm2, %v12684_v2 }
 0x2cf   : > { %v8841_v59 = vsub.f32 %v4386_v24, %v14123_v1  ;;  %v14133_v46 = vand.u32 4294901760, %v4380_v8  ;;  %12441 = vmatpush3.msra.mxu0 %v14123_v1  ;;  %12435 = vmatprep.subr.mxu1 %v12684_v2  ;;  %v12103_v31 = vpop.f32.mrf.mxu1  ;;  %v4566_v16 = vadd.f32 %v14093_v35, %v12068_v44  ;;  %v9267_v39 = vand.u32 4294901760, %v9266_v53 }
 0x2d0   : > { %v4468_v40 = vpop.f32.mrf.mxu0  ;;  %12442 = vmatprep.subr.mxu0 %v12684_v2  ;;  %12436 = vmatpush3.msra.mxu1 %v14072_v63 }
 0x2d1   : > { %v8842_v30 = vand.u32 4294901760, %v8841_v59  ;;  %v8848_v3 = vsub.f32 %v4380_v8, %v14133_v46  ;;  %12443 = vmatpush3.msra.mxu0 %v14133_v46  ;;  %12438 = vmatmul.mubr.f32.vlgmr.msra.gmra.mxu1 %v14017_v23  ;;  %v4560_v23 = vadd.f32 %v14099_v13, %v4468_v40  ;;  %v4887_v10 = vpop.f32.mrf.mxu1 }
 0x2d2   : > { %12454 = vmatprep.subr.mxu0 %v12684_v2  ;;  %12445 = vmatmul.mubr.f32.vlgmr.msra.gmra.mxu0 %v8805_v47 }
 0x2d3   : > { %v8849_v52 = vand.u32 4294901760, %v8848_v3  ;;  %12455 = vmatpush3.msra.mxu0 %v8841_v59  ;;  %12447 = vmatprep.subr.mxu1 %v12684_v2  ;;  %v8843_v33 = vsub.f32 %v8841_v59, %v8842_v30 }
 0x2d4   : > { %v12082_v11 = vpop.f32.mrf.mxu0  ;;  %12456 = vmatprep.subr.mxu0 %v12684_v2  ;;  %12458 = vmatprep.mubr.msk.f32.mxu0 %vm12695_vm2, %v12684_v2 }
 0x2d5   : > { %v4649_v28 = vadd.f32 %v12082_v11, %v4566_v16  ;;  %12457 = vmatpush3.msra.mxu0 %v8848_v3  ;;  %v8844_v56 = vand.u32 4294901760, %v8843_v33  ;;  %v8850_v54 = vsub.f32 %v8848_v3, %v8849_v52  ;;  %12451 = vmatprep.mubr.msk.f32.mxu1 %vm12695_vm2, %v12684_v2  ;;  %v12117_v18 = vpop.f32.mrf.mxu1 }
 0x2d6   : > { %v4641_v0 = vpop.f32.mrf.mxu0  ;;  %12468 = vmatprep.subr.mxu0 %v12684_v2  ;;  %12459 = vmatmul.mubr.f32.vlgmr.msra.gmra.mxu0 %v14090_v58 }
 0x2d7   : > { %v4642_v6 = vadd.f32 %v4641_v0, %v4560_v23  ;;  %v4732_v36 = vadd.f32 %v12089_v25, %v4649_v28  ;;  %12448 = vmatpush3.msra.mxu1 %v8844_v56  ;;  %12469 = vmatpush3.msra.mxu0 %v8842_v30  ;;  %v8851_v27 = vand.u32 4294901760, %v8850_v54  ;;  %v5067_v62 = vpop.f32.mrf.mxu1 }
 0x2d8   : > { %12449 = vmatprep.subr.mxu1 %v12684_v2  ;;  %12470 = vmatprep.subr.mxu0 %v12684_v2 }
 0x2d9   : > { %v4724_v63 = vadd.f32 %v4723_v61, %v4642_v6  ;;  %12450 = vmatpush3.msra.mxu1 %v8851_v27  ;;  %12471 = vmatpush3.msra.mxu0 %v8849_v52  ;;  %v9727_v61 = vand.u32 4294901760, %v14203_v4 }
 0x2da   : > { %v12096_v9 = vpop.f32.mrf.mxu0  ;;  %12452 = vmatmul.mubr.f32.vlgmr.msra.gmra.mxu1 %v14078_v21  ;;  %12461 = vmatprep.subr.mxu1 %v12684_v2 }
 0x2db   : > { %v4815_v37 = vadd.f32 %v12096_v9, %v4732_v36  ;;  %12472 = vmatprep.mubr.msk.f32.mxu0 %vm12695_vm2, %v12684_v2  ;;  %12482 = vmatprep.subr.mxu0 %v12684_v2  ;;  %v12131_v17 = vpop.f32.mrf.mxu1 }
 0x2dc   : > { %v4808_v50 = vpop.f32.mrf.mxu0  ;;  %12462 = vmatpush3.msra.mxu1 %v14123_v1  ;;  %12473 = vmatmul.mubr.f32.vlgmr.msra.gmra.mxu0 %v14078_v21 }
 0x2dd   : > { %v4894_v34 = vadd.f32 %v12103_v31, %v4815_v37  ;;  %v4809_v55 = vadd.f32 %v4808_v50, %v4724_v63  ;;  %12463 = vmatprep.subr.mxu1 %v12684_v2  ;;  %12465 = vmatprep.mubr.msk.f32.mxu1 %vm12695_vm2, %v12684_v2  ;;  %v5231_v38 = vpop.f32.mrf.mxu1  ;;  %v9728_v31 = vsub.f32 %v14203_v4, %v9727_v61 }
 0x2de   : > { %12464 = vmatpush3.msra.mxu1 %v14133_v46  ;;  %12486 = vmatprep.mubr.msk.f32.mxu0 %vm12695_vm2, %v12684_v2 }
 0x2df   : > { %v14181_v5 = vand.u32 4294901760, %v4894_v34  ;;  %v4888_v7 = vadd.f32 %v4887_v10, %v4809_v55  ;;  %12466 = vmatmul.mubr.f32.vlgmr.msra.gmra.mxu1 %v8803_v12  ;;  %12475 = vmatprep.subr.mxu1 %v12684_v2  ;;  %v9729_v10 = vand.u32 4294901760, %v9728_v31 }
 0x2e0   : > { %v12110_v35 = vpop.f32.mrf.mxu0  ;;  %12476 = vmatpush3.msra.mxu1 %v14123_v1  ;;  %12479 = vmatprep.mubr.msk.f32.mxu1 %vm12695_vm2, %v12684_v2 }
 0x2e1   : > { %v9303_v60 = vsub.f32 %v4894_v34, %v14181_v5  ;;  %v14192_v13 = vand.u32 4294901760, %v4888_v7  ;;  %12483 = vmatpush3.msra.mxu0 %v14181_v5  ;;  %12477 = vmatprep.subr.mxu1 %v12684_v2  ;;  %v5074_v12 = vadd.f32 %v12117_v18, %v12110_v35  ;;  %v12145_v45 = vpop.f32.mrf.mxu1 }
 0x2e2   : > { %v4976_v58 = vpop.f32.mrf.mxu0  ;;  %12484 = vmatprep.subr.mxu0 %v12684_v2  ;;  %12478 = vmatpush3.msra.mxu1 %v14133_v46 }
 0x2e3   : > { %v9304_v29 = vand.u32 4294901760, %v9303_v60  ;;  %v9310_v32 = vsub.f32 %v4888_v7, %v14192_v13  ;;  %12485 = vmatpush3.msra.mxu0 %v14192_v13  ;;  %12480 = vmatmul.mubr.f32.vlgmr.msra.gmra.mxu1 %v14078_v21  ;;  %v5068_v22 = vadd.f32 %v5067_v62, %v4976_v58  ;;  %v5395_v52 = vpop.f32.mrf.mxu1 }
 0x2e4   : > { %12496 = vmatprep.subr.mxu0 %v12684_v2  ;;  %12487 = vmatmul.mubr.f32.vlgmr.msra.gmra.mxu0 %v9267_v39 }
 0x2e5   : > { %v9311_v20 = vand.u32 4294901760, %v9310_v32  ;;  %v12124_v25 = vpop.f32.mrf.mxu0  ;;  %12497 = vmatpush3.msra.mxu0 %v9303_v60  ;;  %12489 = vmatprep.subr.mxu1 %v12684_v2  ;;  %v9305_v41 = vsub.f32 %v9303_v60, %v9304_v29 }
 0x2e6   : > { %v5157_v48 = vadd.f32 %v12124_v25, %v5074_v12  ;;  %12498 = vmatprep.subr.mxu0 %v12684_v2  ;;  %12500 = vmatprep.mubr.msk.f32.mxu0 %vm12695_vm2, %v12684_v2 }
 0x2e7   : > { %v5149_v21 = vpop.f32.mrf.mxu0  ;;  %12499 = vmatpush3.msra.mxu0 %v9310_v32  ;;  %v9306_v24 = vand.u32 4294901760, %v9305_v41  ;;  %v9312_v19 = vsub.f32 %v9310_v32, %v9311_v20  ;;  %12493 = vmatprep.mubr.msk.f32.mxu1 %vm12695_vm2, %v12684_v2 }
 0x2e8   : > { %v5150_v1 = vadd.f32 %v5149_v21, %v5068_v22  ;;  %v5240_v8 = vadd.f32 %v12131_v17, %v5157_v48  ;;  %12510 = vmatprep.subr.mxu0 %v12684_v2  ;;  %12501 = vmatmul.mubr.f32.vlgmr.msra.gmra.mxu0 %v14151_v49 }
 0x2e9   : > { %v12138_v44 = vpop.f32.mrf.mxu0  ;;  %12490 = vmatpush3.msra.mxu1 %v9306_v24  ;;  %12511 = vmatpush3.msra.mxu0 %v9304_v29  ;;  %v9313_v47 = vand.u32 4294901760, %v9312_v19  ;;  %v258_v29 = vld [vmem:[%s14490_s4 + $0x48] sm:$0xff] }
 0x2ea   : > { %v5323_v59 = vadd.f32 %v12138_v44, %v5240_v8  ;;  %v5232_v46 = vadd.f32 %v5231_v38, %v5150_v1  ;;  %12491 = vmatprep.subr.mxu1 %v12684_v2  ;;  %12512 = vmatprep.subr.mxu0 %v12684_v2  ;;  %v10580_v41 = vsel %vm1340_vm1, %v258_v29, 0 }
 0x2eb   : > { %v5316_v40 = vpop.f32.mrf.mxu0  ;;  %12492 = vmatpush3.msra.mxu1 %v9313_v47  ;;  %12513 = vmatpush3.msra.mxu0 %v9311_v20  ;;  %v14293_v19 = vand.u32 4294901760, %v10580_v41 }
 0x2ec   : > { %v5402_v30 = vadd.f32 %v12145_v45, %v5323_v59  ;;  %v5317_v3 = vadd.f32 %v5316_v40, %v5232_v46  ;;  %12494 = vmatmul.mubr.f32.vlgmr.msra.gmra.mxu1 %v14139_v14  ;;  %12503 = vmatprep.subr.mxu1 %v12684_v2 }
 0x2ed   : > { %12514 = vmatprep.mubr.msk.f32.mxu0 %vm12695_vm2, %v12684_v2  ;;  %12524 = vmatprep.subr.mxu0 %v12684_v2  ;;  %v14304_v46 = vsub.f32 %v10580_v41, %v14293_v19 }
 0x2ee   : > { %v9687_v16 = vand.u32 4294901760, %v5402_v30  ;;  %v5396_v33 = vadd.f32 %v5395_v52, %v5317_v3  ;;  %12504 = vmatpush3.msra.mxu1 %v14181_v5  ;;  %12515 = vmatmul.mubr.f32.vlgmr.msra.gmra.mxu0 %v14139_v14 }
 0x2ef   : > { %12505 = vmatprep.subr.mxu1 %v12684_v2  ;;  %12507 = vmatprep.mubr.msk.f32.mxu1 %vm12695_vm2, %v12684_v2 }
 0x2f0   : > { %v9765_v11 = vsub.f32 %v5402_v30, %v9687_v16  ;;  %v9690_v23 = vand.u32 4294901760, %v5396_v33  ;;  %12525 = vmatpush3.msra.mxu0 %v9687_v16  ;;  %12506 = vmatpush3.msra.mxu1 %v14192_v13 }
 0x2f1   : > { %12526 = vmatprep.subr.mxu0 %v12684_v2  ;;  %12508 = vmatmul.mubr.f32.vlgmr.msra.gmra.mxu1 %v9265_v43  ;;  %v257_v43 = vld [vmem:[%s14490_s4 + $0x40] sm:$0xff] }
 0x2f2   : > { %v9766_v28 = vand.u32 4294901760, %v9765_v11  ;;  %v9772_v56 = vsub.f32 %v5396_v33, %v9690_v23  ;;  %12527 = vmatpush3.msra.mxu0 %v9690_v23  ;;  %12517 = vmatprep.subr.mxu1 %v12684_v2  ;;  %v10118_v9 = vsel %vm1340_vm1, %v257_v43, 0 }
 0x2f3   : > { %12528 = vmatprep.mubr.msk.f32.mxu0 %vm12695_vm2, %v12684_v2  ;;  %12538 = vmatprep.subr.mxu0 %v12684_v2  ;;  %v14278_v37 = vand.u32 4294901760, %v10118_v9 }
 0x2f4   : > { %v9773_v54 = vand.u32 4294901760, %v9772_v56  ;;  %12518 = vmatpush3.msra.mxu1 %v14181_v5  ;;  %12529 = vmatmul.mubr.f32.vlgmr.msra.gmra.mxu0 %v9729_v10  ;;  %v9767_v0 = vsub.f32 %v9765_v11, %v9766_v28 }
 0x2f5   : > { %12539 = vmatpush3.msra.mxu0 %v9765_v11  ;;  %12519 = vmatprep.subr.mxu1 %v12684_v2  ;;  %v14281_v55 = vsub.f32 %v10118_v9, %v14278_v37 }
 0x2f6   : > { %12540 = vmatprep.subr.mxu0 %v12684_v2  ;;  %12520 = vmatpush3.msra.mxu1 %v14192_v13  ;;  %v9768_v49 = vand.u32 4294901760, %v9767_v0  ;;  %v9774_v6 = vsub.f32 %v9772_v56, %v9773_v54 }
 0x2f7   : > { %12521 = vmatprep.mubr.msk.f32.mxu1 %vm12695_vm2, %v12684_v2  ;;  %12541 = vmatpush3.msra.mxu0 %v9772_v56  ;;  %v10189_v60 = vand.u32 4294901760, %v14281_v55  ;;  %v10651_v56 = vand.u32 4294901760, %v14304_v46 }
 0x2f8   : > { %12522 = vmatmul.mubr.f32.vlgmr.msra.gmra.mxu1 %v14139_v14  ;;  %12531 = vmatprep.subr.mxu1 %v12684_v2  ;;  %v9775_v36 = vand.u32 4294901760, %v9774_v6 }
 0x2f9   : > { %12542 = vmatprep.mubr.msk.f32.mxu0 %vm12695_vm2, %v12684_v2  ;;  %12552 = vmatprep.subr.mxu0 %v12684_v2 }
 0x2fa   : > { %12532 = vmatpush3.msra.mxu1 %v9768_v49  ;;  %12543 = vmatmul.mubr.f32.vlgmr.msra.gmra.mxu0 %v14203_v4  ;;  %v10190_v4 = vsub.f32 %v14281_v55, %v10189_v60 }
 0x2fb   : > { %12553 = vmatpush3.msra.mxu0 %v9766_v28  ;;  %12533 = vmatprep.subr.mxu1 %v12684_v2 }
 0x2fc   : > { %12554 = vmatprep.subr.mxu0 %v12684_v2  ;;  %12534 = vmatpush3.msra.mxu1 %v9775_v36  ;;  %v10191_v24 = vand.u32 4294901760, %v10190_v4 }
 0x2fd   : > { %12535 = vmatprep.mubr.msk.f32.mxu1 %vm12695_vm2, %v12684_v2  ;;  %12555 = vmatpush3.msra.mxu0 %v9773_v54 }
 0x2fe   : > { %12536 = vmatmul.mubr.f32.vlgmr.msra.gmra.mxu1 %v14189_v51  ;;  %12545 = vmatprep.subr.mxu1 %v12684_v2 }
 0x2ff   : > { %12546 = vmatpush3.msra.mxu1 %v9687_v16  ;;  %12549 = vmatprep.mubr.msk.f32.mxu1 %vm12695_vm2, %v12684_v2 }
 0x300   : > { %12547 = vmatprep.subr.mxu1 %v12684_v2  ;;  %12556 = vmatprep.mubr.msk.f32.mxu0 %vm12695_vm2, %v12684_v2 }
 0x301   : > { %12548 = vmatpush3.msra.mxu1 %v9690_v23  ;;  %12557 = vmatmul.mubr.f32.vlgmr.msra.gmra.mxu0 %v14189_v51 }
 0x302   : > { %12550 = vmatmul.mubr.f32.vlgmr.msra.gmra.mxu1 %v9727_v61  ;;  %12559 = vmatprep.subr.mxu1 %v12684_v2 }
 0x303   : > { %12560 = vmatpush3.msra.mxu1 %v9687_v16  ;;  %12563 = vmatprep.mubr.msk.f32.mxu1 %vm12695_vm2, %v12684_v2 }
 0x304   : > { %12561 = vmatprep.subr.mxu1 %v12684_v2  ;;  %12566 = vmatprep.subr.mxu0 %v12684_v2 }
 0x305   : > { %12562 = vmatpush3.msra.mxu1 %v9690_v23  ;;  %12570 = vmatprep.mubr.msk.f32.mxu0 %vm12695_vm2, %v12684_v2 }
 0x306   : > { %12564 = vmatmul.mubr.f32.vlgmr.msra.gmra.mxu1 %v14189_v51  ;;  %12573 = vmatprep.subr.mxu1 %v12684_v2 }
 0x307   : > { %12577 = vmatprep.mubr.msk.f32.mxu1 %vm12695_vm2, %v12684_v2 }
 0x310   : > { %v12159_v14 = vpop.f32.mrf.mxu1 }
 0x312   : > { %v5575_v27 = vpop.f32.mrf.mxu1 }
 0x314   : > { %v12173_v18 = vpop.f32.mrf.mxu1 }
 0x316   : > { %v5739_v63 = vpop.f32.mrf.mxu1 }
 0x318   : > { %v12152_v15 = vpop.f32.mrf.mxu0  ;;  %v12187_v50 = vpop.f32.mrf.mxu1 }
 0x319   : > { %v5582_v62 = vadd.f32 %v12159_v14, %v12152_v15 }
 0x31a   : > { %v5484_v53 = vpop.f32.mrf.mxu0  ;;  %v5903_v5 = vpop.f32.mrf.mxu1 }
 0x31b   : > { %v5576_v42 = vadd.f32 %v5575_v27, %v5484_v53 }
 0x31d   : > { %v12166_v34 = vpop.f32.mrf.mxu0 }
 0x31e   : > { %v5665_v7 = vadd.f32 %v12166_v34, %v5582_v62  ;;  %v12201_v17 = vpop.f32.mrf.mxu1 }
 0x31f   : > { %v5657_v35 = vpop.f32.mrf.mxu0 }
 0x320   : > { %v5658_v39 = vadd.f32 %v5657_v35, %v5576_v42  ;;  %v5748_v51 = vadd.f32 %v12173_v18, %v5665_v7  ;;  %v6083_v20 = vpop.f32.mrf.mxu1  ;;  %v10652_v18 = vsub.f32 %v14304_v46, %v10651_v56 }
 0x322   : > { %v5740_v13 = vadd.f32 %v5739_v63, %v5658_v39  ;;  %v10653_v42 = vand.u32 4294901760, %v10652_v18 }
 0x323   : > { %v12180_v58 = vpop.f32.mrf.mxu0 }
 0x324   : > { %v5831_v32 = vadd.f32 %v12180_v58, %v5748_v51  ;;  %v12215_v8 = vpop.f32.mrf.mxu1 }
 0x325   : > { %v5824_v12 = vpop.f32.mrf.mxu0 }
 0x326   : > { %v5910_v38 = vadd.f32 %v12187_v50, %v5831_v32  ;;  %v5825_v25 = vadd.f32 %v5824_v12, %v5740_v13  ;;  %v6247_v30 = vpop.f32.mrf.mxu1 }
 0x328   : > { %v14291_v22 = vand.u32 4294901760, %v5910_v38  ;;  %v5904_v48 = vadd.f32 %v5903_v5, %v5825_v25 }
 0x329   : > { %v12194_v21 = vpop.f32.mrf.mxu0 }
 0x32a   : > { %v10227_v1 = vsub.f32 %v5910_v38, %v14291_v22  ;;  %v14296_v61 = vand.u32 4294901760, %v5904_v48  ;;  %12567 = vmatpush3.msra.mxu0 %v14291_v22  ;;  %v6090_v59 = vadd.f32 %v12201_v17, %v12194_v21  ;;  %v12229_v54 = vpop.f32.mrf.mxu1 }
 0x32b   : > { %v5992_v45 = vpop.f32.mrf.mxu0  ;;  %12568 = vmatprep.subr.mxu0 %v12684_v2 }
 0x32c   : > { %v10228_v44 = vand.u32 4294901760, %v10227_v1  ;;  %v10234_v47 = vsub.f32 %v5904_v48, %v14296_v61  ;;  %12569 = vmatpush3.msra.mxu0 %v14296_v61  ;;  %v6084_v52 = vadd.f32 %v6083_v20, %v5992_v45  ;;  %v6411_v63 = vpop.f32.mrf.mxu1 }
 0x32d   : > { %12580 = vmatprep.subr.mxu0 %v12684_v2  ;;  %12571 = vmatmul.mubr.f32.vlgmr.msra.gmra.mxu0 %v10191_v24 }
 0x32e   : > { %v10235_v40 = vand.u32 4294901760, %v10234_v47  ;;  %v12208_v3 = vpop.f32.mrf.mxu0  ;;  %12581 = vmatpush3.msra.mxu0 %v10227_v1  ;;  %12584 = vmatprep.mubr.msk.f32.mxu0 %vm12695_vm2, %v12684_v2  ;;  %v10229_v31 = vsub.f32 %v10227_v1, %v10228_v44 }
 0x32f   : > { %v6173_v16 = vadd.f32 %v12208_v3, %v6090_v59  ;;  %12582 = vmatprep.subr.mxu0 %v12684_v2 }
 0x330   : > { %v6165_v33 = vpop.f32.mrf.mxu0  ;;  %12583 = vmatpush3.msra.mxu0 %v10234_v47  ;;  %v10230_v11 = vand.u32 4294901760, %v10229_v31  ;;  %v10236_v23 = vsub.f32 %v10234_v47, %v10235_v40 }
 0x331   : > { %v6166_v10 = vadd.f32 %v6165_v33, %v6084_v52  ;;  %v6256_v28 = vadd.f32 %v12215_v8, %v6173_v16  ;;  %12594 = vmatprep.subr.mxu0 %v12684_v2  ;;  %12585 = vmatmul.mubr.f32.vlgmr.msra.gmra.mxu0 %v14281_v55 }
 0x332   : > { %v12222_v0 = vpop.f32.mrf.mxu0  ;;  %12574 = vmatpush3.msra.mxu1 %v10230_v11  ;;  %12595 = vmatpush3.msra.mxu0 %v10228_v44  ;;  %v10237_v49 = vand.u32 4294901760, %v10236_v23 }
 0x333   : > { %v6339_v6 = vadd.f32 %v12222_v0, %v6256_v28  ;;  %v6248_v36 = vadd.f32 %v6247_v30, %v6166_v10  ;;  %12575 = vmatprep.subr.mxu1 %v12684_v2  ;;  %12596 = vmatprep.subr.mxu0 %v12684_v2 }
 0x334   : > { %v6332_v14 = vpop.f32.mrf.mxu0  ;;  %12576 = vmatpush3.msra.mxu1 %v10237_v49  ;;  %12597 = vmatpush3.msra.mxu0 %v10235_v40 }
 0x335   : > { %v6418_v27 = vadd.f32 %v12229_v54, %v6339_v6  ;;  %v6333_v43 = vadd.f32 %v6332_v14, %v6248_v36  ;;  %12578 = vmatmul.mubr.f32.vlgmr.msra.gmra.mxu1 %v14278_v37  ;;  %12587 = vmatprep.subr.mxu1 %v12684_v2 }
 0x336   : > { %12598 = vmatprep.mubr.msk.f32.mxu0 %vm12695_vm2, %v12684_v2  ;;  %12608 = vmatprep.subr.mxu0 %v12684_v2  ;;  %v6497_v9 = vpop.f32.mrf.mxu0 }
 0x337   : > { %v14322_v15 = vand.u32 4294901760, %v6418_v27  ;;  %v6412_v50 = vadd.f32 %v6411_v63, %v6333_v43  ;;  %12588 = vmatpush3.msra.mxu1 %v14291_v22  ;;  %12599 = vmatmul.mubr.f32.vlgmr.msra.gmra.mxu0 %v14278_v37 }
 0x338   : > { %12589 = vmatprep.subr.mxu1 %v12684_v2  ;;  %12591 = vmatprep.mubr.msk.f32.mxu1 %vm12695_vm2, %v12684_v2  ;;  %v12236_v53 = vpop.f32.mrf.mxu0 }
 0x339   : > { %v10689_v62 = vsub.f32 %v6418_v27, %v14322_v15  ;;  %v14330_v34 = vand.u32 4294901760, %v6412_v50  ;;  %12609 = vmatpush3.msra.mxu0 %v14322_v15  ;;  %12590 = vmatpush3.msra.mxu1 %v14296_v61 }
 0x33a   : > { %12610 = vmatprep.subr.mxu0 %v12684_v2  ;;  %12592 = vmatmul.mubr.f32.vlgmr.msra.gmra.mxu1 %v10189_v60  ;;  %v6654_v5 = vpop.f32.mrf.mxu0 }
 0x33b   : > { %v10690_v7 = vand.u32 4294901760, %v10689_v62  ;;  %v10696_v35 = vsub.f32 %v6412_v50, %v14330_v34  ;;  %12611 = vmatpush3.msra.mxu0 %v14330_v34  ;;  %12601 = vmatprep.subr.mxu1 %v12684_v2 }
 0x33c   : > { %12612 = vmatprep.mubr.msk.f32.mxu0 %vm12695_vm2, %v12684_v2  ;;  %12622 = vmatprep.subr.mxu0 %v12684_v2  ;;  %v6578_v39 = vpop.f32.mrf.mxu1  ;;  %v12250_v51 = vpop.f32.mrf.mxu0 }
 0x33d   : > { %v10697_v17 = vand.u32 4294901760, %v10696_v35  ;;  %12602 = vmatpush3.msra.mxu1 %v14291_v22  ;;  %12613 = vmatmul.mubr.f32.vlgmr.msra.gmra.mxu0 %v10653_v42  ;;  %v10691_v55 = vsub.f32 %v10689_v62, %v10690_v7  ;;  %v6579_v60 = vadd.f32 %v6578_v39, %v6497_v9 }
 0x33e   : > { %12623 = vmatpush3.msra.mxu0 %v10689_v62  ;;  %12603 = vmatprep.subr.mxu1 %v12684_v2  ;;  %v12243_v13 = vpop.f32.mrf.mxu1 }
 0x33f   : > { %12624 = vmatprep.subr.mxu0 %v12684_v2  ;;  %12604 = vmatpush3.msra.mxu1 %v14296_v61  ;;  %v10692_v58 = vand.u32 4294901760, %v10691_v55  ;;  %v10698_v29 = vsub.f32 %v10696_v35, %v10697_v17  ;;  %v6655_v32 = vadd.f32 %v6654_v5, %v6579_v60  ;;  %v6806_v12 = vpop.f32.mrf.mxu0 }
 0x340   : > { %12605 = vmatprep.mubr.msk.f32.mxu1 %vm12695_vm2, %v12684_v2  ;;  %12625 = vmatpush3.msra.mxu0 %v10696_v35 }
 0x341   : > { %12606 = vmatmul.mubr.f32.vlgmr.msra.gmra.mxu1 %v14278_v37  ;;  %12615 = vmatprep.subr.mxu1 %v12684_v2  ;;  %v10699_v4 = vand.u32 4294901760, %v10698_v29  ;;  %v12264_v20 = vpop.f32.mrf.mxu0 }
 0x342   : > { %12626 = vmatprep.mubr.msk.f32.mxu0 %vm12695_vm2, %v12684_v2  ;;  %12636 = vmatprep.subr.mxu0 %v12684_v2  ;;  %v6729_v38 = vpop.f32.mrf.mxu1 }
 0x343   : > { %12616 = vmatpush3.msra.mxu1 %v10692_v58  ;;  %12627 = vmatmul.mubr.f32.vlgmr.msra.gmra.mxu0 %v14304_v46  ;;  %v6730_v25 = vadd.f32 %v6729_v38, %v6655_v32 }
 0x344   : > { %12637 = vmatpush3.msra.mxu0 %v10690_v7  ;;  %12617 = vmatprep.subr.mxu1 %v12684_v2  ;;  %v12257_v41 = vpop.f32.mrf.mxu1 }
 0x345   : > { %12638 = vmatprep.subr.mxu0 %v12684_v2  ;;  %12618 = vmatpush3.msra.mxu1 %v10699_v4  ;;  %v6807_v37 = vadd.f32 %v6806_v12, %v6730_v25 }
 0x346   : > { %12619 = vmatprep.mubr.msk.f32.mxu1 %vm12695_vm2, %v12684_v2  ;;  %12639 = vmatpush3.msra.mxu0 %v10697_v17  ;;  %v6879_v22 = vpop.f32.mrf.mxu1 }
 0x347   : > { %12620 = vmatmul.mubr.f32.vlgmr.msra.gmra.mxu1 %v14293_v19  ;;  %12629 = vmatprep.subr.mxu1 %v12684_v2  ;;  %v14361_v48 = vadd.f32 %v6879_v22, %v6807_v37  ;;  %v6959_v21 = vpop.f32.mrf.mxu0 }
 0x348   : > { %12630 = vmatpush3.msra.mxu1 %v14322_v15  ;;  %12633 = vmatprep.mubr.msk.f32.mxu1 %vm12695_vm2, %v12684_v2  ;;  %v12271_v24 = vpop.f32.mrf.mxu1 }
 0x349   : > { %12631 = vmatprep.subr.mxu1 %v12684_v2  ;;  %12640 = vmatprep.mubr.msk.f32.mxu0 %vm12695_vm2, %v12684_v2  ;;  %v12278_v1 = vpop.f32.mrf.mxu0 }
 0x34a   : > { %12632 = vmatpush3.msra.mxu1 %v14330_v34  ;;  %12641 = vmatmul.mubr.f32.vlgmr.msra.gmra.mxu0 %v14293_v19 }
 0x34b   : > { %12634 = vmatmul.mubr.f32.vlgmr.msra.gmra.mxu1 %v10651_v56  ;;  %12643 = vmatprep.subr.mxu1 %v12684_v2  ;;  %v7116_v8 = vpop.f32.mrf.mxu0 }
 0x34c   : > { %12644 = vmatpush3.msra.mxu1 %v14322_v15  ;;  %12647 = vmatprep.mubr.msk.f32.mxu1 %vm12695_vm2, %v12684_v2 }
 0x34d   : > { %12645 = vmatprep.subr.mxu1 %v12684_v2  ;;  %v12292_v61 = vpop.f32.mrf.mxu0 }
 0x34e   : > { %12646 = vmatpush3.msra.mxu1 %v14330_v34 }
 0x34f   : > { %12648 = vmatmul.mubr.f32.vlgmr.msra.gmra.mxu1 %v14293_v19  ;;  %v7040_v45 = vpop.f32.mrf.mxu1 }
 0x350   : > { %v7041_v44 = vadd.f32 %v7040_v45, %v6959_v21 }
 0x351   : > { %v12285_v47 = vpop.f32.mrf.mxu1  ;;  %v7268_v59 = vpop.f32.mrf.mxu0 }
 0x352   : > { %v7117_v46 = vadd.f32 %v7116_v8, %v7041_v44 }
 0x353   : > { %v12306_v40 = vpop.f32.mrf.mxu0 }
 0x354   : > { %v7191_v30 = vpop.f32.mrf.mxu1 }
 0x355   : > { %v7192_v3 = vadd.f32 %v7191_v30, %v7117_v46 }
 0x356   : > { %v12299_v31 = vpop.f32.mrf.mxu1 }
 0x357   : > { %v7269_v52 = vadd.f32 %v7268_v59, %v7192_v3 }
 0x358   : > { %v7341_v16 = vpop.f32.mrf.mxu1 }
 0x359   : > { %v7342_v33 = vadd.f32 %v7341_v16, %v7269_v52 }
 0x35a   : > { %v12313_v11 = vpop.f32.mrf.mxu1 }
 0x35c   : > { %v7421_v23 = vpop.f32.mrf.mxu0 }
 0x35e   : > { %v12320_v10 = vpop.f32.mrf.mxu0 }
 0x360   : > { %v7578_v28 = vpop.f32.mrf.mxu0 }
 0x362   : > { %v12334_v56 = vpop.f32.mrf.mxu0 }
 0x364   : > { %v7502_v54 = vpop.f32.mrf.mxu1 }
 0x365   : > { %v7503_v0 = vadd.f32 %v7502_v54, %v7421_v23 }
 0x366   : > { %v12327_v19 = vpop.f32.mrf.mxu1  ;;  %v7730_v49 = vpop.f32.mrf.mxu0 }
 0x367   : > { %v7579_v6 = vadd.f32 %v7578_v28, %v7503_v0 }
 0x368   : > { %v12348_v36 = vpop.f32.mrf.mxu0 }
 0x369   : > { %v7653_v14 = vpop.f32.mrf.mxu1 }
 0x36a   : > { %v7654_v27 = vadd.f32 %v7653_v14, %v7579_v6 }
 0x36b   : > { %v12341_v43 = vpop.f32.mrf.mxu1 }
 0x36c   : > { %v7731_v18 = vadd.f32 %v7730_v49, %v7654_v27 }
 0x36d   : > { %v7803_v63 = vpop.f32.mrf.mxu1 }
 0x36e   : > { %v7804_v9 = vadd.f32 %v7803_v63, %v7731_v18  ;;  %v7883_v15 = vpop.f32.mrf.mxu0 }
 0x36f   : > { %v12355_v50 = vpop.f32.mrf.mxu1 }
 0x370   : > { %v11041_v53 = vcombine.low %v14361_v48, %v7804_v9  ;;  %v11042_v62 = vcombine.high %v14361_v48, %v7804_v9  ;;  %v12362_v34 = vpop.f32.mrf.mxu0 }
 0x372   : > { %v8040_v42 = vpop.f32.mrf.mxu0  ;;  %v14383_v38 = vrot.slane %v11041_v53, %v12967_v57  ;;  %v14386_v25 = vrot.slane %v11042_v62, %v12967_v57 }
 0x374   : > { %v12376_v5 = vpop.f32.mrf.mxu0 }
 0x376   : > { %v7964_v7 = vpop.f32.mrf.mxu1 }
 0x377   : > { %v7965_v35 = vadd.f32 %v7964_v7, %v7883_v15 }
 0x378   : > { %v12369_v39 = vpop.f32.mrf.mxu1  ;;  %v8192_v51 = vpop.f32.mrf.mxu0 }
 0x379   : > { %v8041_v17 = vadd.f32 %v8040_v42, %v7965_v35 }
 0x37a   : > { %v12390_v55 = vpop.f32.mrf.mxu0 }
 0x37b   : > { %v8115_v60 = vpop.f32.mrf.mxu1 }
 0x37c   : > { %v8116_v13 = vadd.f32 %v8115_v60, %v8041_v17 }
 0x37d   : > { %v12383_v58 = vpop.f32.mrf.mxu1 }
 0x37e   : > { %v8193_v29 = vadd.f32 %v8192_v51, %v8116_v13 }
 0x37f   : > { %v8265_v32 = vpop.f32.mrf.mxu1 }
 0x380   : > { %v8266_v12 = vadd.f32 %v8265_v32, %v8193_v29  ;;  %v8345_v4 = vpop.f32.mrf.mxu0 }
 0x381   : > { %v12397_v20 = vpop.f32.mrf.mxu1 }
 0x382   : > { %v11057_v41 = vcombine.low %v7342_v33, %v8266_v12  ;;  %v11058_v37 = vcombine.high %v7342_v33, %v8266_v12  ;;  %v12404_v22 = vpop.f32.mrf.mxu0 }
 0x384   : > { %v14389_v48 = vrot.slane %v11057_v41, %v12967_v57  ;;  %v14392_v21 = vrot.slane %v11058_v37, %v12967_v57  ;;  %v8502_v24 = vpop.f32.mrf.mxu0 }
 0x386   : > { %v11105_v1 = vcombine.low %v14383_v38, %v14389_v48  ;;  %v11106_v8 = vcombine.high %v14383_v38, %v14389_v48  ;;  %v11121_v61 = vcombine.low %v14386_v25, %v14392_v21  ;;  %v11122_v45 = vcombine.high %v14386_v25, %v14392_v21  ;;  %v12418_v44 = vpop.f32.mrf.mxu0 }
 0x388   : > { %v8426_v47 = vpop.f32.mrf.mxu1 }
 0x389   : > { %v8427_v50 = vadd.f32 %v8426_v47, %v8345_v4 }
 0x38a   : > { %v12411_v59 = vpop.f32.mrf.mxu1  ;;  %v8654_v46 = vpop.f32.mrf.mxu0 }
 0x38b   : > { %v8503_v5 = vadd.f32 %v8502_v24, %v8427_v50 }
 0x38c   : > { %v12432_v40 = vpop.f32.mrf.mxu0 }
 0x38d   : > { %v8577_v30 = vpop.f32.mrf.mxu1 }
 0x38e   : > { %v8578_v17 = vadd.f32 %v8577_v30, %v8503_v5 }
 0x38f   : > { %v12425_v3 = vpop.f32.mrf.mxu1 }
 0x390   : > { %v8655_v32 = vadd.f32 %v8654_v46, %v8578_v17 }
 0x391   : > { %v8727_v31 = vpop.f32.mrf.mxu1 }
 0x392   : > { %v8807_v52 = vpop.f32.mrf.mxu0  ;;  %v8728_v22 = vadd.f32 %v8727_v31, %v8655_v32 }
 0x393   : > { %v12439_v16 = vpop.f32.mrf.mxu1 }
 0x394   : > { %v12446_v33 = vpop.f32.mrf.mxu0 }
 0x396   : > { %v8964_v11 = vpop.f32.mrf.mxu0 }
 0x398   : > { %v12460_v23 = vpop.f32.mrf.mxu0 }
 0x39a   : > { %v8888_v10 = vpop.f32.mrf.mxu1 }
 0x39b   : > { %v8889_v7 = vadd.f32 %v8888_v10, %v8807_v52 }
 0x39c   : > { %v12453_v28 = vpop.f32.mrf.mxu1  ;;  %v9116_v56 = vpop.f32.mrf.mxu0 }
 0x39d   : > { %v8965_v55 = vadd.f32 %v8964_v11, %v8889_v7 }
 0x39e   : > { %v12474_v54 = vpop.f32.mrf.mxu0 }
 0x39f   : > { %v9039_v0 = vpop.f32.mrf.mxu1 }
 0x3a0   : > { %v9040_v12 = vadd.f32 %v9039_v0, %v8965_v55 }
 0x3a1   : > { %v12467_v19 = vpop.f32.mrf.mxu1 }
 0x3a2   : > { %v9117_v44 = vadd.f32 %v9116_v56, %v9040_v12 }
 0x3a3   : > { %v9189_v49 = vpop.f32.mrf.mxu1 }
 0x3a4   : > { %v9269_v6 = vpop.f32.mrf.mxu0  ;;  %v9190_v16 = vadd.f32 %v9189_v49, %v9117_v44 }
 0x3a5   : > { %v12481_v36 = vpop.f32.mrf.mxu1 }
 0x3a6   : > { %v12488_v14 = vpop.f32.mrf.mxu0  ;;  %v14408_v36 = vrot.slane %v11105_v1, %v12979_v26  ;;  %v11120_v1 = vrot.slane %v11106_v8, %v12979_v26  ;;  %v11136_v8 = vrot.slane %v11122_v45, %v12979_v26 }
 0x3a8   : > { %v9426_v27 = vpop.f32.mrf.mxu0 }
 0x3aa   : > { %v12502_v43 = vpop.f32.mrf.mxu0 }
 0x3ac   : > { %v9350_v18 = vpop.f32.mrf.mxu1 }
 0x3ad   : > { %v9351_v53 = vadd.f32 %v9350_v18, %v9269_v6 }
 0x3ae   : > { %v12495_v63 = vpop.f32.mrf.mxu1  ;;  %v9578_v9 = vpop.f32.mrf.mxu0 }
 0x3af   : > { %v9427_v35 = vadd.f32 %v9426_v27, %v9351_v53 }
 0x3b0   : > { %v12516_v15 = vpop.f32.mrf.mxu0 }
 0x3b1   : > { %v9501_v62 = vpop.f32.mrf.mxu1 }
 0x3b2   : > { %v9502_v60 = vadd.f32 %v9501_v62, %v9427_v35  ;;  %v11129_v62 = vrot.slane %v11121_v61, %v12979_v26 }
 0x3b3   : > { %v12509_v34 = vpop.f32.mrf.mxu1 }
 0x3b4   : > { %v9731_v42 = vpop.f32.mrf.mxu0  ;;  %v9579_v20 = vadd.f32 %v9578_v9, %v9502_v60 }
 0x3b6   : > { %v12530_v39 = vpop.f32.mrf.mxu0 }
 0x3b8   : > { %v9651_v51 = vpop.f32.mrf.mxu1 }
 0x3b9   : > { %v9652_v47 = vadd.f32 %v9651_v51, %v9579_v20 }
 0x3ba   : > { %v12523_v13 = vpop.f32.mrf.mxu1  ;;  %v9888_v58 = vpop.f32.mrf.mxu0 }
 0x3bb   : > { %v11073_v33 = vcombine.low %v8728_v22, %v9652_v47  ;;  %v11074_v31 = vcombine.high %v8728_v22, %v9652_v47 }
 0x3bc   : > { %v12544_v29 = vpop.f32.mrf.mxu0 }
 0x3bd   : > { %v11081_v28 = vrot.slane %v11073_v33, %v12967_v57  ;;  %v11088_v14 = vrot.slane %v11074_v31, %v12967_v57 }
 0x3be   : > { %v9812_v41 = vpop.f32.mrf.mxu1 }
 0x3bf   : > { %v9813_v4 = vadd.f32 %v9812_v41, %v9731_v42 }
 0x3c0   : > { %v12537_v37 = vpop.f32.mrf.mxu1 }
 0x3c1   : > { %v9889_v24 = vadd.f32 %v9888_v58, %v9813_v4  ;;  %v10040_v59 = vpop.f32.mrf.mxu0 }
 0x3c2   : > { %v9963_v40 = vpop.f32.mrf.mxu1 }
 0x3c3   : > { %v9964_v3 = vadd.f32 %v9963_v40, %v9889_v24  ;;  %v12558_v52 = vpop.f32.mrf.mxu0 }
 0x3c4   : > { %v12551_v30 = vpop.f32.mrf.mxu1 }
 0x3c5   : > { %v10041_v11 = vadd.f32 %v10040_v59, %v9964_v3 }
 0x3c6   : > { %v10113_v23 = vpop.f32.mrf.mxu1 }
 0x3c7   : > { %v10114_v10 = vadd.f32 %v10113_v23, %v10041_v11 }
 0x3c8   : > { %v12565_v46 = vpop.f32.mrf.mxu1 }
 0x3c9   : > { %v11089_v54 = vcombine.low %v9190_v16, %v10114_v10  ;;  %v11090_v56 = vcombine.high %v9190_v16, %v10114_v10 }
 0x3cb   : > { %v11097_v0 = vrot.slane %v11089_v54, %v12967_v57  ;;  %v11104_v27 = vrot.slane %v11090_v56, %v12967_v57 }
 0x3cd   : > { %v11137_v19 = vcombine.low %v11081_v28, %v11097_v0  ;;  %v11138_v6 = vcombine.high %v11081_v28, %v11097_v0  ;;  %v11153_v9 = vcombine.low %v11088_v14, %v11104_v27  ;;  %v11154_v34 = vcombine.high %v11088_v14, %v11104_v27 }
 0x3cf   : > { %v14411_v49 = vrot.slane %v11137_v19, %v12979_v26  ;;  %v11152_v18 = vrot.slane %v11138_v6, %v12979_v26  ;;  %v11161_v53 = vrot.slane %v11153_v9, %v12979_v26  ;;  %v11168_v48 = vrot.slane %v11154_v34, %v12979_v26 }
 0x3d1   : > { %v11170_v43 = vcombine.high %v14408_v36, %v14411_v49  ;;  %v11169_v63 = vcombine.low %v14408_v36, %v14411_v49  ;;  %v11171_v15 = vcombine.low %v11120_v1, %v11152_v18  ;;  %v11172_v50 = vcombine.high %v11120_v1, %v11152_v18 }
 0x3d2   : > { %v11173_v42 = vcombine.low %v11129_v62, %v11161_v53  ;;  %v11174_v38 = vcombine.high %v11129_v62, %v11161_v53  ;;  %v11175_v5 = vcombine.low %v11136_v8, %v11168_v48  ;;  %v11176_v7 = vcombine.high %v11136_v8, %v11168_v48 }
 0x3d3   : > { %11245 = vrot.lane.b32.xlu0 %v11170_v43, %s12696_s8 }
 0x3d7   : > { %11253 = vrot.lane.b32.xlu0 %v11171_v15, %s12692_s11 }
 0x3db   : > { %11261 = vrot.lane.b32.xlu0 %v11172_v50, %s12697_s15 }
 0x3df   : > { %11269 = vrot.lane.b32.xlu0 %v11173_v42, %s12691_s10 }
 0x3e3   : > { %11277 = vrot.lane.b32.xlu0 %v11174_v38, %s12698_s16 }
 0x3e7   : > { %11285 = vrot.lane.b32.xlu0 %v11175_v5, %s12690_s9 }
 0x3eb   : > { %11293 = vrot.lane.b32.xlu0 %v11176_v7, %s12699_s17 }
 0x3ed   : > { %v10193_v61 = vpop.f32.mrf.mxu0 }
 0x3ef   : > { %v12572_v35 = vpop.f32.mrf.mxu0 }
 0x3f1   : > { %v10350_v39 = vpop.f32.mrf.mxu0 }
 0x3f3   : > { %v12586_v51 = vpop.f32.mrf.mxu0 }
 0x3f5   : > { %v10274_v17 = vpop.f32.mrf.mxu1 }
 0x3f6   : > { %v10275_v25 = vadd.f32 %v10274_v17, %v10193_v61 }
 0x3f7   : > { %v12579_v55 = vpop.f32.mrf.mxu1  ;;  %v10502_v60 = vpop.f32.mrf.mxu0 }
 0x3f8   : > { %v10351_v12 = vadd.f32 %v10350_v39, %v10275_v25 }
 0x3f9   : > { %v12600_v13 = vpop.f32.mrf.mxu0 }
 0x3fa   : > { %v10425_v58 = vpop.f32.mrf.mxu1 }
 0x3fb   : > { %v10426_v37 = vadd.f32 %v10425_v58, %v10351_v12 }
 0x3fc   : > { %v12593_v29 = vpop.f32.mrf.mxu1 }
 0x3fd   : > { %v10655_v32 = vpop.f32.mrf.mxu0  ;;  %v10503_v24 = vadd.f32 %v10502_v60, %v10426_v37 }
 0x3ff   : > { %v12614_v21 = vpop.f32.mrf.mxu0 }
 0x401   : > { %v10575_v45 = vpop.f32.mrf.mxu1 }
 0x402   : > { %v10576_v33 = vadd.f32 %v10575_v45, %v10503_v24 }
 0x403   : > { %v12607_v20 = vpop.f32.mrf.mxu1  ;;  %v10812_v41 = vpop.f32.mrf.mxu0 }
 0x404   : > { %v11184_v28 = vrot.slane %v10576_v33, %v12967_v57  ;;  %v11177_v14 = vcombine.high %v10576_v33, %v12684_v2 }
 0x405   : > { %v12628_v4 = vpop.f32.mrf.mxu0 }
 0x406   : > { %v11191_v18 = vrot.slane %v11177_v14, %v12967_v57 }
 0x407   : > { %v10736_v22 = vpop.f32.mrf.mxu1 }
 0x408   : > { %v10737_v44 = vadd.f32 %v10736_v22, %v10655_v32 }
 0x409   : > { %v12621_v47 = vpop.f32.mrf.mxu1 }
 0x40a   : > { %v10813_v59 = vadd.f32 %v10812_v41, %v10737_v44  ;;  %v10964_v40 = vpop.f32.mrf.mxu0 }
 0x40b   : > { %v10887_v3 = vpop.f32.mrf.mxu1 }
 0x40c   : > { %v10888_v52 = vadd.f32 %v10887_v3, %v10813_v59  ;;  %v12642_v30 = vpop.f32.mrf.mxu0 }
 0x40d   : > { %v12635_v16 = vpop.f32.mrf.mxu1 }
 0x40e   : > { %v10965_v11 = vadd.f32 %v10964_v40, %v10888_v52 }
 0x40f   : > { %v11037_v23 = vpop.f32.mrf.mxu1 }
 0x410   : > { %v11038_v10 = vadd.f32 %v11037_v23, %v10965_v11 }
 0x411   : > { %v12649_v46 = vpop.f32.mrf.mxu1 }
 0x412   : > { %v11199_v54 = vrot.slane %v11038_v10, %v12967_v57  ;;  %v11192_v56 = vcombine.high %v11038_v10, %v12684_v2 }
 0x414   : > { %v11207_v0 = vcombine.low %v11184_v28, %v11199_v54  ;;  %v11208_v31 = vcombine.high %v11184_v28, %v11199_v54  ;;  %v11206_v27 = vrot.slane %v11192_v56, %v12967_v57 }
 0x416   : > { %v11222_v19 = vrot.slane %v11208_v31, %v12979_v26  ;;  %v11215_v6 = vrot.slane %v11207_v0, %v12979_v26  ;;  %v11223_v9 = vcombine.low %v11191_v18, %v11206_v27  ;;  %v11224_v50 = vcombine.high %v11191_v18, %v11206_v27 }
 0x418   : > { %11255 = vrot.lane.b32.xlu1 %v11222_v19, %s12692_s11  ;;  %v11239_v43 = vcombine.high %v11215_v6, %v12684_v2  ;;  %v11240_v1 = vcombine.high %v11222_v19, %v12684_v2  ;;  %v11231_v15 = vrot.slane %v11223_v9, %v12979_v26  ;;  %v11238_v53 = vrot.slane %v11224_v50, %v12979_v26 }
 0x41a   : > { %v11241_v62 = vcombine.high %v11231_v15, %v12684_v2  ;;  %v11242_v57 = vcombine.high %v11238_v53, %v12684_v2 }
 0x41c   : > { %11247 = vrot.lane.b32.xlu1 %v11239_v43, %s12696_s8 }
 0x420   : > { %11263 = vrot.lane.b32.xlu1 %v11240_v1, %s12697_s15 }
 0x424   : > { %11271 = vrot.lane.b32.xlu1 %v11231_v15, %s12691_s10 }
 0x428   : > { %11287 = vrot.lane.b32.xlu1 %v11238_v53, %s12690_s9  ;;  %s11389_s9 = sshll.u32 %s14493_s19, 4 }
 0x429   : > { %s224_s20 = scalar_lea.vmem %s14491_s5, %s11389_s9 }
 0x42c   : > { %11279 = vrot.lane.b32.xlu1 %v11241_v62, %s12698_s16 }
 0x430   : > { %11295 = vrot.lane.b32.xlu1 %v11242_v57, %s12699_s17 }
 0x445   : > { %v11246_v34 = vpop.permute.xlu0 %11245 }
 0x446   : > { %v11300_v26 = vsel %vm11299_vm3, %v11169_v63, %v11246_v34 }
 0x449   : > { %v11254_v42 = vpop.permute.xlu0 %11253 }
 0x44a   : > { %v11302_v5 = vsel %vm1340_vm1, %v11300_v26, %v11254_v42 }
 0x44d   : > { %v11262_v38 = vpop.permute.xlu0 %11261 }
 0x44e   : > { %v11305_v2 = vsel %vm11304_vm4, %v11302_v5, %v11262_v38 }
 0x451   : > { %v11270_v48 = vpop.permute.xlu0 %11269 }
 0x452   : > { %v11307_v61 = vsel %vm277_vm0, %v11305_v2, %v11270_v48 }
 0x455   : > { %v11278_v8 = vpop.permute.xlu0 %11277 }
 0x456   : > { %v11310_v35 = vsel %vm11309_vm5, %v11307_v61, %v11278_v8 }
 0x459   : > { %v11286_v7 = vpop.permute.xlu0 %11285 }
 0x45a   : > { %v11313_v36 = vsel %vm11312_vm6, %v11310_v35, %v11286_v7 }
 0x45d   : > { %v11294_v49 = vpop.permute.xlu0 %11293 }
 0x45e   : > { %v11316_v63 = vsel %vm11315_vm7, %v11313_v36, %v11294_v49 }
 0x45f   : > { %11319 = vst.msk [vmem:[%s224_s20] sm:$0xff] %vm11318_vm8, %v11316_v63 }
 0x48a   : > { %v11256_v39 = vpop.permute.xlu1 %11255 }
 0x48e   : > { %v11248_v51 = vpop.permute.xlu1 %11247 }
 0x48f   : > { %v11301_v60 = vsel %vm11299_vm3, %v11215_v6, %v11248_v51 }
 0x490   : > { %v11303_v58 = vsel %vm1340_vm1, %v11301_v60, %v11256_v39 }
 0x492   : > { %v11264_v17 = vpop.permute.xlu1 %11263 }
 0x493   : > { %v11306_v29 = vsel %vm11304_vm4, %v11303_v58, %v11264_v17 }
 0x496   : > { %v11272_v55 = vpop.permute.xlu1 %11271 }
 0x497   : > { %v11308_v32 = vsel %vm277_vm0, %v11306_v29, %v11272_v55 }
 0x49a   : > { %v11288_v13 = vpop.permute.xlu1 %11287 }
 0x49e   : > { %v11280_v25 = vpop.permute.xlu1 %11279 }
 0x49f   : > { %v11311_v21 = vsel %vm11309_vm5, %v11308_v32, %v11280_v25 }
 0x4a0   : > { %v11314_v45 = vsel %vm11312_vm6, %v11311_v21, %v11288_v13 }
 0x4a2   : > { %v11296_v12 = vpop.permute.xlu1 %11295 }
 0x4a3   : > { %v11317_v20 = vsel %vm11315_vm7, %v11314_v45, %v11296_v12 }
 0x4a4   : > { %11321 = vst.msk [vmem:[%s224_s20 + $0x8] sm:$0x3] %vm11320_vm9, %v11317_v20 }
 0x4a5 PF: > { %s15_s18 = sadd.s32 1, %s12682_s18  }
 0x4a6   : > { %p12_p4 = scmp.ge.s32.totalorder %s15_s18, 4  }
 0x4a8   :  { %14 = sbr.rel (!%p12_p4) target bundleno = 1 (0x1), region = 70 }

</bundles_post_ra>
